<compile_context>
chip_gen: v7x
topology: tpu7x:2x2x1
jax: 0.10.0
libtpu: 0.0.40
codegen_flags: <defaults>
</compile_context>

<pallas_src>
import functools

import jax
import jax.numpy as jnp
from jax.experimental import pallas as pl
from jax.experimental.pallas import tpu as pltpu

# ---------------------------------------------------------------------------
# Synthetic config (mirrors the TUTA/FORTAP config fields that drive shapes).
# ---------------------------------------------------------------------------
CFG = dict(
    vocab_size=256,
    op_vocab_size=32,
    hidden_size=64,
    intermediate_size=128,
    num_layers=2,
    num_heads=4,
    magnitude_size=12,
    precision_size=12,
    top_digit_size=12,
    low_digit_size=12,
    max_cell_length=16,
    row_size=32,
    column_size=32,
    tree_depth=4,
    node_degree=8,
    num_format_feature=11,
    sr_classes=2,
    nr_classes=8,
    sr_context_classes=2,
    ln_eps=1e-12,
)


# ---------------------------------------------------------------------------
# In-kernel helpers
# ---------------------------------------------------------------------------
def _ln(z, g, b, eps):
    mu = jnp.mean(z, axis=-1, keepdims=True)
    var = jnp.mean((z - mu) ** 2, axis=-1, keepdims=True)
    return (z - mu) * jax.lax.rsqrt(var + eps) * g + b


def _softmax_lastdim(s):
    # f32 softmax; denominator reciprocal goes to the EUP slot (approx vrcp).
    m = jnp.max(s, axis=-1, keepdims=True)
    p = jnp.exp(s - m)
    return p * pl.reciprocal(jnp.sum(p, axis=-1, keepdims=True), approx=True)


# ---------------------------------------------------------------------------
# Pallas kernels
# ---------------------------------------------------------------------------
def _encoder_layer_kernel(x_ref, m_ref,
                          wqkv_ref, bqkv_ref, wo_ref, bo_ref,
                          g1_ref, be1_ref, w1_ref, b1_ref, w2_ref, b2_ref,
                          g2_ref, be2_ref, o_ref, *, num_heads, eps):
    """Full transformer encoder layer for one batch element, fused in VMEM."""
    x = x_ref[0].astype(jnp.float32)                      # [S, H]
    hidden = x.shape[-1]
    hd = hidden // num_heads
    scale = 1.0 / float(hd) ** 0.5
    mask = m_ref[0]                                        # [1, S] additive key mask

    # Fused QKV projection: single [H, 3H] bf16 matmul (lane-dense N = 3H).
    qkv = jnp.dot(x.astype(jnp.bfloat16), wqkv_ref[...],
                  preferred_element_type=jnp.float32) + bqkv_ref[...]
    q = qkv[:, 0:hidden]
    k = qkv[:, hidden:2 * hidden]
    v = qkv[:, 2 * hidden:3 * hidden]

    # All heads for this batch element handled in-kernel (static unroll).
    ctx_parts = []
    for hh in range(num_heads):
        lo, hi = hh * hd, (hh + 1) * hd
        qh = q[:, lo:hi].astype(jnp.bfloat16)
        kh = k[:, lo:hi].astype(jnp.bfloat16)
        vh = v[:, lo:hi].astype(jnp.bfloat16)
        sc = jax.lax.dot_general(qh, kh, (((1,), (1,)), ((), ())),
                                 preferred_element_type=jnp.float32) * scale
        sc = sc + mask                                     # broadcast over queries
        p = _softmax_lastdim(sc)                           # f32 softmax, EUP reciprocal
        ctx_parts.append(jnp.dot(p.astype(jnp.bfloat16), vh,
                                 preferred_element_type=jnp.float32))
    ctx = jnp.concatenate(ctx_parts, axis=-1)              # [S, H]

    attn_out = jnp.dot(ctx.astype(jnp.bfloat16), wo_ref[...],
                       preferred_element_type=jnp.float32) + bo_ref[...]
    h1 = _ln(x + attn_out, g1_ref[...], be1_ref[...], eps)

    # Fused FFN: intermediate activation never leaves VMEM.
    ff = jnp.dot(h1.astype(jnp.bfloat16), w1_ref[...],
                 preferred_element_type=jnp.float32) + b1_ref[...]
    # TODO(synk): PyTorch GELU is erf-based; we use the tanh approximation (EUP friendly).
    ff = jax.nn.gelu(ff)
    ff = jnp.dot(ff.astype(jnp.bfloat16), w2_ref[...],
                 preferred_element_type=jnp.float32) + b2_ref[...]
    out = _ln(h1 + ff, g2_ref[...], be2_ref[...], eps)
    o_ref[0] = out.astype(o_ref.dtype)


def _embed_fmt_ln_kernel(emb_ref, fv_ref, w_ref, b_ref, g_ref, be_ref, o_ref, *, eps):
    """format_vec linear + embedding sum + LayerNorm, fused."""
    fmt = jnp.dot(fv_ref[...].astype(jnp.bfloat16), w_ref[...],
                  preferred_element_type=jnp.float32) + b_ref[...]
    z = emb_ref[...].astype(jnp.float32) + fmt
    o_ref[...] = _ln(z, g_ref[...], be_ref[...], eps).astype(o_ref.dtype)


def _heads_kernel(x_ref,
                  wtm_ref, btm_ref, gm_ref, bem_ref, wdm_ref, bdm_ref,
                  wto_ref, bto_ref, go_ref, beo_ref, wdo_ref, bdo_ref,
                  ws_ref, bs_ref,
                  mlm_ref, op_ref, small_ref, *, eps):
    """All token-level heads fused: the encoded tile is loaded once and reused.

    MLM head: transform + GELU + LN + decoder (vocab, lane-dense).
    OpMLM head: transform + GELU + LN + decoder (padded to 128 lanes).
    sr / nr / sr_context heads: single packed 128-wide lane-dense linear decoder.
    """
    x32 = x_ref[...].astype(jnp.float32)
    x = x32.astype(jnp.bfloat16)

    # --- MLM head ---
    h = jnp.dot(x, wtm_ref[...], preferred_element_type=jnp.float32) + btm_ref[...]
    h = jax.nn.gelu(h)
    h = _ln(h, gm_ref[...], bem_ref[...], eps)
    mlm_ref[...] = (jnp.dot(h.astype(jnp.bfloat16), wdm_ref[...],
                            preferred_element_type=jnp.float32)
                    + bdm_ref[...]).astype(mlm_ref.dtype)

    # --- OpMLM head ---
    h2 = jnp.dot(x, wto_ref[...], preferred_element_type=jnp.float32) + bto_ref[...]
    h2 = jax.nn.gelu(h2)
    h2 = _ln(h2, go_ref[...], beo_ref[...], eps)
    op_ref[...] = (jnp.dot(h2.astype(jnp.bfloat16), wdo_ref[...],
                           preferred_element_type=jnp.float32)
                   + bdo_ref[...]).astype(op_ref.dtype)

    # --- sr / nr / sr_context packed classifiers ---
    small_ref[...] = (jnp.dot(x, ws_ref[...], preferred_element_type=jnp.float32)
                      + bs_ref[...]).astype(small_ref.dtype)


def _pointer_kernel(e_ref, w_ref, b_ref, c_ref, o_ref, *, scale, hidden):
    """Range-MLM pointer head: fused q/k projection ([H, 2H]) + pointer scores."""
    e = e_ref[0].astype(jnp.bfloat16)                      # [S, H]
    qk = jnp.dot(e, w_ref[...], preferred_element_type=jnp.float32) + b_ref[...]
    qp = qk[:, :hidden].astype(jnp.bfloat16)
    kp = qk[:, hidden:].astype(jnp.bfloat16)
    sc = jax.lax.dot_general(qp, kp, (((1,), (1,)), ((), ())),
                             preferred_element_type=jnp.float32) * scale
    sc = sc + (1.0 - c_ref[0]) * (-1e9)                    # mask out non-candidate keys
    o_ref[0] = sc.astype(o_ref.dtype)


# ---------------------------------------------------------------------------
# pallas_call wrappers
# ---------------------------------------------------------------------------
def _full_spec(arr):
    return pl.BlockSpec(arr.shape, lambda i, n=arr.ndim: (0,) * n)


def _rows_call(kernel, row_inputs, param_inputs, out_dim, *, tm=None, cost_estimate=None):
    """Tile row-wise inputs over the M axis ("parallel"); weights stay resident."""
    m = row_inputs[0].shape[0]
    tm = m if tm is None else min(tm, m)
    row_specs = [pl.BlockSpec((tm, a.shape[1]), lambda i: (i, 0)) for a in row_inputs]
    return pl.pallas_call(
        kernel,
        out_shape=jax.ShapeDtypeStruct((m, out_dim), jnp.float32),
        grid=(pl.cdiv(m, tm),),
        in_specs=row_specs + [_full_spec(w) for w in param_inputs],
        out_specs=pl.BlockSpec((tm, out_dim), lambda i: (i, 0)),
        compiler_params=pltpu.CompilerParams(dimension_semantics=("parallel",)),
        cost_estimate=cost_estimate,
    )(*row_inputs, *param_inputs)


def encoder_layer(x, mask_add, p, cfg):
    b, s, h = x.shape
    nh = cfg["num_heads"]
    i_size = cfg["intermediate_size"]
    wqkv = jnp.concatenate([p["q"]["w"], p["k"]["w"], p["v"]["w"]], axis=1).astype(jnp.bfloat16)
    bqkv = jnp.concatenate([p["q"]["b"], p["k"]["b"], p["v"]["b"]], axis=1)
    weights = [wqkv, bqkv,
               p["o"]["w"].astype(jnp.bfloat16), p["o"]["b"],
               p["ln1"]["g"], p["ln1"]["b"],
               p["ffn1"]["w"].astype(jnp.bfloat16), p["ffn1"]["b"],
               p["ffn2"]["w"].astype(jnp.bfloat16), p["ffn2"]["b"],
               p["ln2"]["g"], p["ln2"]["b"]]
    kernel = functools.partial(_encoder_layer_kernel, num_heads=nh, eps=cfg["ln_eps"])
    ce = pl.CostEstimate(
        flops=2 * b * s * h * (4 * h + 2 * i_size) + 4 * b * nh * s * s * (h // nh),
        transcendentals=b * s * (i_size + 2 * nh * s),
        bytes_accessed=4 * (2 * b * s * h) + 2 * (4 * h * h + 2 * h * i_size),
    )
    return pl.pallas_call(
        kernel,
        out_shape=jax.ShapeDtypeStruct((b, s, h), jnp.float32),
        grid=(b,),
        in_specs=[pl.BlockSpec((1, s, h), lambda i: (i, 0, 0)),
                  pl.BlockSpec((1, 1, s), lambda i: (i, 0, 0))]
                 + [_full_spec(w) for w in weights],
        out_specs=pl.BlockSpec((1, s, h), lambda i: (i, 0, 0)),
        compiler_params=pltpu.CompilerParams(dimension_semantics=("parallel",)),
        cost_estimate=ce,
    )(x, mask_add, *weights)


# ---------------------------------------------------------------------------
# Backbone (TUTA-style transformer encoder)
# ---------------------------------------------------------------------------
def tree_embed(table, pos):
    # table: [depth, degree, H]; pos: [B, S, depth] (per-depth tree coordinate)
    out = 0.0
    for d in range(table.shape[0]):
        out = out + table[d][pos[..., d]]
    return out


def backbone(params, cfg, token_id, num_mag, num_pre, num_top, num_low, token_order,
             pos_row, pos_col, pos_top, pos_left, format_vec, indicator):
    b, s = token_id.shape
    h = cfg["hidden_size"]
    emb = params["tok_emb"][token_id]
    emb = emb + params["mag_emb"][num_mag] + params["pre_emb"][num_pre]
    emb = emb + params["topdig_emb"][num_top] + params["lowdig_emb"][num_low]
    emb = emb + params["order_emb"][token_order]
    emb = emb + params["row_emb"][pos_row] + params["col_emb"][pos_col]
    emb = emb + tree_embed(params["tree_top_emb"], pos_top)
    emb = emb + tree_embed(params["tree_left_emb"], pos_left)

    kernel = functools.partial(_embed_fmt_ln_kernel, eps=cfg["ln_eps"])
    x2 = _rows_call(
        kernel,
        [emb.reshape(b * s, h), format_vec.reshape(b * s, -1).astype(jnp.float32)],
        [params["fmt_lin"]["w"].astype(jnp.bfloat16), params["fmt_lin"]["b"],
         params["emb_ln"]["g"], params["emb_ln"]["b"]],
        h)
    x = x2.reshape(b, s, h)

    # TODO(synk): real TUTA builds tree-distance-based attention masks; here we only
    # mask padded positions (indicator == 0).
    mask_add = jnp.where(indicator != 0, 0.0, -1e9).astype(jnp.float32).reshape(b, 1, s)
    for lp in params["layers"]:
        x = encoder_layer(x, mask_add, lp, cfg)
    return x


# ---------------------------------------------------------------------------
# Heads (each returns a (loss, n_correct, n_valid) triple, ignore_index = -1)
# ---------------------------------------------------------------------------
def cross_entropy_stats(logits, labels, extra_valid=None):
    valid = labels >= 0
    if extra_valid is not None:
        valid = jnp.logical_and(valid, extra_valid)
    safe = jnp.where(valid, labels, 0)
    logp = jax.nn.log_softmax(logits, axis=-1)
    nll = -jnp.take_along_axis(logp, safe[..., None], axis=-1)[..., 0]
    nll = jnp.where(valid, nll, 0.0)
    count = valid.sum().astype(jnp.int32)
    loss = nll.sum() / jnp.maximum(count, 1).astype(jnp.float32)
    pred = jnp.argmax(logits, axis=-1)
    correct = jnp.where(valid, pred == safe, False).sum().astype(jnp.int32)
    return loss, correct, count


def _pad_cols(w, b, target):
    pad = target - w.shape[1]
    if pad > 0:
        w = jnp.pad(w, ((0, 0), (0, pad)))
        b = jnp.pad(b, ((0, 0), (0, pad)))
    return w, b


def fused_heads(e2, params, cfg):
    """Single pallas_call producing mlm / op_mlm / (sr,nr,sr_ctx) logits."""
    # TODO(synk): at production TUTA scale (H=768, vocab~30k) the MLM decoder matmul must
    # be tiled over (M, N, K) with a VMEM f32 accumulator; whole-block is fine at test scale.
    m, h = e2.shape
    n_sr, n_nr, n_ctx = cfg["sr_classes"], cfg["nr_classes"], cfg["sr_context_classes"]

    v_mlm = params["mlm"]["decoder"]["w"].shape[1]
    v_op = params["op_mlm"]["decoder"]["w"].shape[1]
    vp_mlm = ((v_mlm + 127) // 128) * 128
    vp_op = ((v_op + 127) // 128) * 128
    wdm, bdm = _pad_cols(params["mlm"]["decoder"]["w"], params["mlm"]["decoder"]["b"], vp_mlm)
    wdo, bdo = _pad_cols(params["op_mlm"]["decoder"]["w"], params["op_mlm"]["decoder"]["b"], vp_op)

    ws = jnp.concatenate([params["sr"]["w"], params["nr"]["w"], params["sr_ctx"]["w"]], axis=1)
    bs = jnp.concatenate([params["sr"]["b"], params["nr"]["b"], params["sr_ctx"]["b"]], axis=1)
    ncat = n_sr + n_nr + n_ctx
    npad = ((ncat + 127) // 128) * 128
    ws, bs = _pad_cols(ws, bs, npad)

    weights = [
        params["mlm"]["transform"]["w"].astype(jnp.bfloat16), params["mlm"]["transform"]["b"],
        params["mlm"]["ln"]["g"], params["mlm"]["ln"]["b"],
        wdm.astype(jnp.bfloat16), bdm,
        params["op_mlm"]["transform"]["w"].astype(jnp.bfloat16), params["op_mlm"]["transform"]["b"],
        params["op_mlm"]["ln"]["g"], params["op_mlm"]["ln"]["b"],
        wdo.astype(jnp.bfloat16), bdo,
        ws.astype(jnp.bfloat16), bs,
    ]

    tm = m if m <= 512 else 512
    kernel = functools.partial(_heads_kernel, eps=cfg["ln_eps"])
    ce = pl.CostEstimate(
        flops=2 * m * h * (2 * h + vp_mlm + vp_op + npad),
        transcendentals=2 * m * h,
        bytes_accessed=4 * m * (h + vp_mlm + vp_op + npad)
                       + 2 * (2 * h * h + h * (vp_mlm + vp_op + npad)),
    )
    mlm_logits, op_logits, small_logits = pl.pallas_call(
        kernel,
        out_shape=(jax.ShapeDtypeStruct((m, vp_mlm), jnp.float32),
                   jax.ShapeDtypeStruct((m, vp_op), jnp.float32),
                   jax.ShapeDtypeStruct((m, npad), jnp.float32)),
        grid=(pl.cdiv(m, tm),),
        in_specs=[pl.BlockSpec((tm, h), lambda i: (i, 0))] + [_full_spec(w) for w in weights],
        out_specs=(pl.BlockSpec((tm, vp_mlm), lambda i: (i, 0)),
                   pl.BlockSpec((tm, vp_op), lambda i: (i, 0)),
                   pl.BlockSpec((tm, npad), lambda i: (i, 0))),
        compiler_params=pltpu.CompilerParams(dimension_semantics=("parallel",)),
        cost_estimate=ce,
    )(e2, *weights)

    mlm_logits = mlm_logits[:, :v_mlm]
    op_logits = op_logits[:, :v_op]
    sr_logits = small_logits[:, :n_sr]
    nr_logits = small_logits[:, n_sr:n_sr + n_nr]
    ctx_logits = small_logits[:, n_sr + n_nr:ncat]
    return mlm_logits, op_logits, sr_logits, nr_logits, ctx_logits


def range_mlm_logits(encoded, p, candi_cell_token_mask):
    b, s, h = encoded.shape
    wqk = jnp.concatenate([p["q"]["w"], p["k"]["w"]], axis=1).astype(jnp.bfloat16)
    bqk = jnp.concatenate([p["q"]["b"], p["k"]["b"]], axis=1)
    candi = candi_cell_token_mask.astype(jnp.float32).reshape(b, 1, s)
    kernel = functools.partial(_pointer_kernel, scale=1.0 / (h ** 0.5), hidden=h)
    return pl.pallas_call(
        kernel,
        out_shape=jax.ShapeDtypeStruct((b, s, s), jnp.float32),
        grid=(b,),
        in_specs=[pl.BlockSpec((1, s, h), lambda i: (i, 0, 0)),
                  _full_spec(wqk), _full_spec(bqk),
                  pl.BlockSpec((1, 1, s), lambda i: (i, 0, 0))],
        out_specs=pl.BlockSpec((1, s, s), lambda i: (i, 0, 0)),
        compiler_params=pltpu.CompilerParams(dimension_semantics=("parallel",)),
    )(encoded, wqk, bqk, candi)


# ---------------------------------------------------------------------------
# FortapTUTA forward
# ---------------------------------------------------------------------------
def fortap_tuta_forward(params, token_id, num_mag, num_pre, num_top, num_low,
                        token_order, pos_row, pos_col, pos_top, pos_left, format_vec,
                        indicator, mlm_label, sr_label, nr_label, op_appear_flag,
                        sr_context_label, op_mlm_label, range_mlm_label,
                        candi_cell_token_mask):
    cfg = CFG
    encoded = backbone(params, cfg, token_id, num_mag, num_pre, num_top, num_low,
                       token_order, pos_row, pos_col, pos_top, pos_left, format_vec,
                       indicator)
    b, s, h = encoded.shape
    e2 = encoded.reshape(b * s, h)

    mlm_logits, op_logits, sr_logits, nr_logits, ctx_logits = fused_heads(e2, params, cfg)
    range_logits = range_mlm_logits(encoded, params["range_mlm"], candi_cell_token_mask)

    mlm_triple = cross_entropy_stats(mlm_logits.reshape(b, s, -1), mlm_label)
    sr_triple = cross_entropy_stats(sr_logits.reshape(b, s, -1), sr_label)
    nr_triple = cross_entropy_stats(nr_logits.reshape(b, s, -1), nr_label,
                                    op_appear_flag[:, None] > 0)
    sr_context_triple = cross_entropy_stats(ctx_logits.reshape(b, s, -1), sr_context_label,
                                            indicator != 0)
    op_mlm_triple = cross_entropy_stats(op_logits.reshape(b, s, -1), op_mlm_label)
    range_mlm_triple = cross_entropy_stats(range_logits, range_mlm_label)
    return (mlm_triple, sr_triple, nr_triple, sr_context_triple, op_mlm_triple,
            range_mlm_triple)


# ---------------------------------------------------------------------------
# Deterministic parameter init
# ---------------------------------------------------------------------------
def init_params(key, cfg):
    h = cfg["hidden_size"]
    kit = iter(jax.random.split(key, 128))

    def emb(n, d):
        return jax.random.normal(next(kit), (n, d), jnp.float32) * 0.02

    def dense(din, dout):
        return {"w": jax.random.normal(next(kit), (din, dout), jnp.float32) * 0.02,
                "b": jnp.zeros((1, dout), jnp.float32)}

    def ln():
        return {"g": jnp.ones((1, h), jnp.float32), "b": jnp.zeros((1, h), jnp.float32)}

    params = {
        "tok_emb": emb(cfg["vocab_size"], h),
        "mag_emb": emb(cfg["magnitude_size"], h),
        "pre_emb": emb(cfg["precision_size"], h),
        "topdig_emb": emb(cfg["top_digit_size"], h),
        "lowdig_emb": emb(cfg["low_digit_size"], h),
        "order_emb": emb(cfg["max_cell_length"], h),
        "row_emb": emb(cfg["row_size"], h),
        "col_emb": emb(cfg["column_size"], h),
        "tree_top_emb": jax.random.normal(next(kit), (cfg["tree_depth"], cfg["node_degree"], h),
                                          jnp.float32) * 0.02,
        "tree_left_emb": jax.random.normal(next(kit), (cfg["tree_depth"], cfg["node_degree"], h),
                                           jnp.float32) * 0.02,
        "fmt_lin": dense(cfg["num_format_feature"], h),
        "emb_ln": ln(),
        "layers": [],
        "mlm": {"transform": dense(h, h), "ln": ln(), "decoder": dense(h, cfg["vocab_size"])},
        "sr": dense(h, cfg["sr_classes"]),
        "nr": dense(h, cfg["nr_classes"]),
        "sr_ctx": dense(h, cfg["sr_context_classes"]),
        "op_mlm": {"transform": dense(h, h), "ln": ln(), "decoder": dense(h, cfg["op_vocab_size"])},
        "range_mlm": {"q": dense(h, h), "k": dense(h, h)},
    }
    for _ in range(cfg["num_layers"]):
        params["layers"].append({
            "q": dense(h, h), "k": dense(h, h), "v": dense(h, h), "o": dense(h, h),
            "ln1": ln(),
            "ffn1": dense(h, cfg["intermediate_size"]),
            "ffn2": dense(cfg["intermediate_size"], h),
            "ln2": ln(),
        })
    return params


# ---------------------------------------------------------------------------
# Main
# ---------------------------------------------------------------------------
if __name__ == "__main__":
    cfg = CFG
    B, S = 2, 16
    key = jax.random.PRNGKey(0)
    pkey, dkey = jax.random.split(key)
    params = init_params(pkey, cfg)
    ks = list(jax.random.split(dkey, 32))

    token_id = jax.random.randint(ks[0], (B, S), 1, cfg["vocab_size"])
    num_mag = jax.random.randint(ks[1], (B, S), 0, cfg["magnitude_size"])
    num_pre = jax.random.randint(ks[2], (B, S), 0, cfg["precision_size"])
    num_top = jax.random.randint(ks[3], (B, S), 0, cfg["top_digit_size"])
    num_low = jax.random.randint(ks[4], (B, S), 0, cfg["low_digit_size"])
    token_order = jax.random.randint(ks[5], (B, S), 0, cfg["max_cell_length"])
    pos_row = jax.random.randint(ks[6], (B, S), 0, cfg["row_size"])
    pos_col = jax.random.randint(ks[7], (B, S), 0, cfg["column_size"])
    pos_top = jax.random.randint(ks[8], (B, S, cfg["tree_depth"]), 0, cfg["node_degree"])
    pos_left = jax.random.randint(ks[9], (B, S, cfg["tree_depth"]), 0, cfg["node_degree"])
    format_vec = jax.random.uniform(ks[10], (B, S, cfg["num_format_feature"]), jnp.float32)
    indicator = jnp.broadcast_to(
        jnp.where(jnp.arange(S) < 12, jnp.arange(S) + 1, 0), (B, S)).astype(jnp.int32)

    def sparse_labels(k, maxval, keep_prob):
        k1, k2 = jax.random.split(k)
        lab = jax.random.randint(k1, (B, S), 0, maxval)
        keep = jax.random.uniform(k2, (B, S)) < keep_prob
        return jnp.where(keep, lab, -1)

    mlm_label = sparse_labels(ks[11], cfg["vocab_size"], 0.3)
    sr_label = sparse_labels(ks[12], cfg["sr_classes"], 0.5)
    nr_label = sparse_labels(ks[13], cfg["nr_classes"], 0.5)
    op_appear_flag = jnp.array([1, 0], dtype=jnp.int32)
    sr_context_label = sparse_labels(ks[14], cfg["sr_context_classes"], 0.5)
    op_mlm_label = sparse_labels(ks[15], cfg["op_vocab_size"], 0.3)
    range_mlm_label = sparse_labels(ks[16], S, 0.3)
    candi_cell_token_mask = (jax.random.uniform(ks[17], (B, S)) < 0.5).astype(jnp.int32)
    candi_cell_token_mask = candi_cell_token_mask.at[:, 0].set(1)

    fwd = jax.jit(fortap_tuta_forward)
    out = fwd(params, token_id, num_mag, num_pre, num_top, num_low, token_order,
              pos_row, pos_col, pos_top, pos_left, format_vec, indicator,
              mlm_label, sr_label, nr_label, op_appear_flag, sr_context_label,
              op_mlm_label, range_mlm_label, candi_cell_token_mask)
    jax.block_until_ready(out)
    print("KERNEL_OK")
</pallas_src>

<mosaic_0001>
module attributes {stable_mosaic.version = 11 : i64} {
  func.func @_encoder_layer_kernel(%arg0: i32, %arg1: memref<1x16x64xf32, #tpu.memory_space<vmem>>, %arg2: memref<1x1x16xf32, #tpu.memory_space<vmem>>, %arg3: memref<64x192xbf16, #tpu.memory_space<vmem>>, %arg4: memref<1x192xf32, #tpu.memory_space<vmem>>, %arg5: memref<64x64xbf16, #tpu.memory_space<vmem>>, %arg6: memref<1x64xf32, #tpu.memory_space<vmem>>, %arg7: memref<1x64xf32, #tpu.memory_space<vmem>>, %arg8: memref<1x64xf32, #tpu.memory_space<vmem>>, %arg9: memref<64x128xbf16, #tpu.memory_space<vmem>>, %arg10: memref<1x128xf32, #tpu.memory_space<vmem>>, %arg11: memref<128x64xbf16, #tpu.memory_space<vmem>>, %arg12: memref<1x64xf32, #tpu.memory_space<vmem>>, %arg13: memref<1x64xf32, #tpu.memory_space<vmem>>, %arg14: memref<1x64xf32, #tpu.memory_space<vmem>>, %arg15: memref<1x16x64xf32, #tpu.memory_space<vmem>>) attributes {dimension_semantics = [#tpu.dimension_semantics<parallel>], iteration_bounds = array<i64: 2>, scalar_prefetch = 0 : i64, scratch_operands = 0 : i64, tpu.core_type = #tpu.core_type<tc>, window_params = [{transform_indices = @transform_0, window_bounds = array<i64: 1, 16, 64>}, {transform_indices = @transform_1, window_bounds = array<i64: 1, 1, 16>}, {pipeline_mode = #tpu.pipeline_mode<synchronous>, transform_indices = @transform_2, window_bounds = array<i64: 64, 192>}, {pipeline_mode = #tpu.pipeline_mode<synchronous>, transform_indices = @transform_3, window_bounds = array<i64: 1, 192>}, {pipeline_mode = #tpu.pipeline_mode<synchronous>, transform_indices = @transform_4, window_bounds = array<i64: 64, 64>}, {pipeline_mode = #tpu.pipeline_mode<synchronous>, transform_indices = @transform_5, window_bounds = array<i64: 1, 64>}, {pipeline_mode = #tpu.pipeline_mode<synchronous>, transform_indices = @transform_6, window_bounds = array<i64: 1, 64>}, {pipeline_mode = #tpu.pipeline_mode<synchronous>, transform_indices = @transform_7, window_bounds = array<i64: 1, 64>}, {pipeline_mode = #tpu.pipeline_mode<synchronous>, transform_indices = @transform_8, window_bounds = array<i64: 64, 128>}, {pipeline_mode = #tpu.pipeline_mode<synchronous>, transform_indices = @transform_9, window_bounds = array<i64: 1, 128>}, {pipeline_mode = #tpu.pipeline_mode<synchronous>, transform_indices = @transform_10, window_bounds = array<i64: 128, 64>}, {pipeline_mode = #tpu.pipeline_mode<synchronous>, transform_indices = @transform_11, window_bounds = array<i64: 1, 64>}, {pipeline_mode = #tpu.pipeline_mode<synchronous>, transform_indices = @transform_12, window_bounds = array<i64: 1, 64>}, {pipeline_mode = #tpu.pipeline_mode<synchronous>, transform_indices = @transform_13, window_bounds = array<i64: 1, 64>}, {transform_indices = @transform_14, window_bounds = array<i64: 1, 16, 64>}]} {
    %c0 = arith.constant 0 : index
    %c0_0 = arith.constant 0 : index
    %c0_1 = arith.constant 0 : index
    %0 = vector.load %arg1[%c0, %c0_0, %c0_1] : memref<1x16x64xf32, #tpu.memory_space<vmem>>, vector<1x16x64xf32>
    %1 = vector.shape_cast %0 : vector<1x16x64xf32> to vector<16x64xf32>
    %c0_2 = arith.constant 0 : index
    %c0_3 = arith.constant 0 : index
    %c0_4 = arith.constant 0 : index
    %2 = vector.load %arg2[%c0_2, %c0_3, %c0_4] : memref<1x1x16xf32, #tpu.memory_space<vmem>>, vector<1x1x16xf32>
    %3 = vector.shape_cast %2 : vector<1x1x16xf32> to vector<1x16xf32>
    %4 = arith.truncf %1 : vector<16x64xf32> to vector<16x64xbf16>
    %c0_5 = arith.constant 0 : index
    %c0_6 = arith.constant 0 : index
    %5 = vector.load %arg3[%c0_5, %c0_6] : memref<64x192xbf16, #tpu.memory_space<vmem>>, vector<64x192xbf16>
    %cst = arith.constant dense<0.000000e+00> : vector<16x192xf32>
    %6 = tpu.matmul %4, %5, %cst {dimension_numbers = #tpu.dot_dimension_numbers<[1], [0], [0], [1], [0, 0, 1, 1], [], []>} : vector<16x64xbf16>, vector<64x192xbf16>, vector<16x192xf32> -> vector<16x192xf32>
    %c0_7 = arith.constant 0 : index
    %c0_8 = arith.constant 0 : index
    %7 = vector.load %arg4[%c0_7, %c0_8] : memref<1x192xf32, #tpu.memory_space<vmem>>, vector<1x192xf32>
    %8 = vector.broadcast %7 : vector<1x192xf32> to vector<16x192xf32>
    %9 = arith.addf %6, %8 : vector<16x192xf32>
    %10 = vector.extract_strided_slice %9 {offsets = [0, 0], sizes = [16, 64], strides = [1, 1]} : vector<16x192xf32> to vector<16x64xf32>
    %11 = vector.extract_strided_slice %9 {offsets = [0, 64], sizes = [16, 64], strides = [1, 1]} : vector<16x192xf32> to vector<16x64xf32>
    %12 = vector.extract_strided_slice %9 {offsets = [0, 128], sizes = [16, 64], strides = [1, 1]} : vector<16x192xf32> to vector<16x64xf32>
    %13 = vector.extract_strided_slice %10 {offsets = [0, 0], sizes = [16, 16], strides = [1, 1]} : vector<16x64xf32> to vector<16x16xf32>
    %14 = arith.truncf %13 : vector<16x16xf32> to vector<16x16xbf16>
    %15 = vector.extract_strided_slice %11 {offsets = [0, 0], sizes = [16, 16], strides = [1, 1]} : vector<16x64xf32> to vector<16x16xf32>
    %16 = arith.truncf %15 : vector<16x16xf32> to vector<16x16xbf16>
    %17 = vector.extract_strided_slice %12 {offsets = [0, 0], sizes = [16, 16], strides = [1, 1]} : vector<16x64xf32> to vector<16x16xf32>
    %18 = arith.truncf %17 : vector<16x16xf32> to vector<16x16xbf16>
    %cst_9 = arith.constant dense<0.000000e+00> : vector<16x16xf32>
    %19 = tpu.matmul %14, %16, %cst_9 {dimension_numbers = #tpu.dot_dimension_numbers<[1], [1], [0], [0], [0, 0, 1, 0], [], []>} : vector<16x16xbf16>, vector<16x16xbf16>, vector<16x16xf32> -> vector<16x16xf32>
    %cst_10 = arith.constant 2.500000e-01 : f32
    %20 = vector.broadcast %cst_10 : f32 to vector<16x16xf32>
    %21 = arith.mulf %19, %20 : vector<16x16xf32>
    %22 = vector.broadcast %3 : vector<1x16xf32> to vector<16x16xf32>
    %23 = arith.addf %21, %22 : vector<16x16xf32>
    %cst_11 = arith.constant dense<0xFF800000> : vector<16xf32>
    %24 = vector.multi_reduction <maximumf>, %23, %cst_11 [1] : vector<16x16xf32> to vector<16xf32>
    %25 = vector.shape_cast %24 : vector<16xf32> to vector<16x1xf32>
    %26 = vector.broadcast %25 : vector<16x1xf32> to vector<16x16xf32>
    %27 = arith.subf %23, %26 : vector<16x16xf32>
    %28 = math.exp %27 : vector<16x16xf32>
    %cst_12 = arith.constant dense<0.000000e+00> : vector<16xf32>
    %29 = vector.multi_reduction <add>, %28, %cst_12 [1] : vector<16x16xf32> to vector<16xf32>
    %30 = vector.shape_cast %29 : vector<16xf32> to vector<16x1xf32>
    %31 = tpu.reciprocal %30 {approx = true} : vector<16x1xf32> -> vector<16x1xf32>
    %32 = vector.broadcast %31 : vector<16x1xf32> to vector<16x16xf32>
    %33 = arith.mulf %28, %32 : vector<16x16xf32>
    %34 = arith.truncf %33 : vector<16x16xf32> to vector<16x16xbf16>
    %cst_13 = arith.constant dense<0.000000e+00> : vector<16x16xf32>
    %35 = tpu.matmul %34, %18, %cst_13 {dimension_numbers = #tpu.dot_dimension_numbers<[1], [0], [0], [1], [0, 0, 1, 1], [], []>} : vector<16x16xbf16>, vector<16x16xbf16>, vector<16x16xf32> -> vector<16x16xf32>
    %36 = vector.extract_strided_slice %10 {offsets = [0, 16], sizes = [16, 16], strides = [1, 1]} : vector<16x64xf32> to vector<16x16xf32>
    %37 = arith.truncf %36 : vector<16x16xf32> to vector<16x16xbf16>
    %38 = vector.extract_strided_slice %11 {offsets = [0, 16], sizes = [16, 16], strides = [1, 1]} : vector<16x64xf32> to vector<16x16xf32>
    %39 = arith.truncf %38 : vector<16x16xf32> to vector<16x16xbf16>
    %40 = vector.extract_strided_slice %12 {offsets = [0, 16], sizes = [16, 16], strides = [1, 1]} : vector<16x64xf32> to vector<16x16xf32>
    %41 = arith.truncf %40 : vector<16x16xf32> to vector<16x16xbf16>
    %cst_14 = arith.constant dense<0.000000e+00> : vector<16x16xf32>
    %42 = tpu.matmul %37, %39, %cst_14 {dimension_numbers = #tpu.dot_dimension_numbers<[1], [1], [0], [0], [0, 0, 1, 0], [], []>} : vector<16x16xbf16>, vector<16x16xbf16>, vector<16x16xf32> -> vector<16x16xf32>
    %cst_15 = arith.constant 2.500000e-01 : f32
    %43 = vector.broadcast %cst_15 : f32 to vector<16x16xf32>
    %44 = arith.mulf %42, %43 : vector<16x16xf32>
    %45 = vector.broadcast %3 : vector<1x16xf32> to vector<16x16xf32>
    %46 = arith.addf %44, %45 : vector<16x16xf32>
    %cst_16 = arith.constant dense<0xFF800000> : vector<16xf32>
    %47 = vector.multi_reduction <maximumf>, %46, %cst_16 [1] : vector<16x16xf32> to vector<16xf32>
    %48 = vector.shape_cast %47 : vector<16xf32> to vector<16x1xf32>
    %49 = vector.broadcast %48 : vector<16x1xf32> to vector<16x16xf32>
    %50 = arith.subf %46, %49 : vector<16x16xf32>
    %51 = math.exp %50 : vector<16x16xf32>
    %cst_17 = arith.constant dense<0.000000e+00> : vector<16xf32>
    %52 = vector.multi_reduction <add>, %51, %cst_17 [1] : vector<16x16xf32> to vector<16xf32>
    %53 = vector.shape_cast %52 : vector<16xf32> to vector<16x1xf32>
    %54 = tpu.reciprocal %53 {approx = true} : vector<16x1xf32> -> vector<16x1xf32>
    %55 = vector.broadcast %54 : vector<16x1xf32> to vector<16x16xf32>
    %56 = arith.mulf %51, %55 : vector<16x16xf32>
    %57 = arith.truncf %56 : vector<16x16xf32> to vector<16x16xbf16>
    %cst_18 = arith.constant dense<0.000000e+00> : vector<16x16xf32>
    %58 = tpu.matmul %57, %41, %cst_18 {dimension_numbers = #tpu.dot_dimension_numbers<[1], [0], [0], [1], [0, 0, 1, 1], [], []>} : vector<16x16xbf16>, vector<16x16xbf16>, vector<16x16xf32> -> vector<16x16xf32>
    %59 = vector.extract_strided_slice %10 {offsets = [0, 32], sizes = [16, 16], strides = [1, 1]} : vector<16x64xf32> to vector<16x16xf32>
    %60 = arith.truncf %59 : vector<16x16xf32> to vector<16x16xbf16>
    %61 = vector.extract_strided_slice %11 {offsets = [0, 32], sizes = [16, 16], strides = [1, 1]} : vector<16x64xf32> to vector<16x16xf32>
    %62 = arith.truncf %61 : vector<16x16xf32> to vector<16x16xbf16>
    %63 = vector.extract_strided_slice %12 {offsets = [0, 32], sizes = [16, 16], strides = [1, 1]} : vector<16x64xf32> to vector<16x16xf32>
    %64 = arith.truncf %63 : vector<16x16xf32> to vector<16x16xbf16>
    %cst_19 = arith.constant dense<0.000000e+00> : vector<16x16xf32>
    %65 = tpu.matmul %60, %62, %cst_19 {dimension_numbers = #tpu.dot_dimension_numbers<[1], [1], [0], [0], [0, 0, 1, 0], [], []>} : vector<16x16xbf16>, vector<16x16xbf16>, vector<16x16xf32> -> vector<16x16xf32>
    %cst_20 = arith.constant 2.500000e-01 : f32
    %66 = vector.broadcast %cst_20 : f32 to vector<16x16xf32>
    %67 = arith.mulf %65, %66 : vector<16x16xf32>
    %68 = vector.broadcast %3 : vector<1x16xf32> to vector<16x16xf32>
    %69 = arith.addf %67, %68 : vector<16x16xf32>
    %cst_21 = arith.constant dense<0xFF800000> : vector<16xf32>
    %70 = vector.multi_reduction <maximumf>, %69, %cst_21 [1] : vector<16x16xf32> to vector<16xf32>
    %71 = vector.shape_cast %70 : vector<16xf32> to vector<16x1xf32>
    %72 = vector.broadcast %71 : vector<16x1xf32> to vector<16x16xf32>
    %73 = arith.subf %69, %72 : vector<16x16xf32>
    %74 = math.exp %73 : vector<16x16xf32>
    %cst_22 = arith.constant dense<0.000000e+00> : vector<16xf32>
    %75 = vector.multi_reduction <add>, %74, %cst_22 [1] : vector<16x16xf32> to vector<16xf32>
    %76 = vector.shape_cast %75 : vector<16xf32> to vector<16x1xf32>
    %77 = tpu.reciprocal %76 {approx = true} : vector<16x1xf32> -> vector<16x1xf32>
    %78 = vector.broadcast %77 : vector<16x1xf32> to vector<16x16xf32>
    %79 = arith.mulf %74, %78 : vector<16x16xf32>
    %80 = arith.truncf %79 : vector<16x16xf32> to vector<16x16xbf16>
    %cst_23 = arith.constant dense<0.000000e+00> : vector<16x16xf32>
    %81 = tpu.matmul %80, %64, %cst_23 {dimension_numbers = #tpu.dot_dimension_numbers<[1], [0], [0], [1], [0, 0, 1, 1], [], []>} : vector<16x16xbf16>, vector<16x16xbf16>, vector<16x16xf32> -> vector<16x16xf32>
    %82 = vector.extract_strided_slice %10 {offsets = [0, 48], sizes = [16, 16], strides = [1, 1]} : vector<16x64xf32> to vector<16x16xf32>
    %83 = arith.truncf %82 : vector<16x16xf32> to vector<16x16xbf16>
    %84 = vector.extract_strided_slice %11 {offsets = [0, 48], sizes = [16, 16], strides = [1, 1]} : vector<16x64xf32> to vector<16x16xf32>
    %85 = arith.truncf %84 : vector<16x16xf32> to vector<16x16xbf16>
    %86 = vector.extract_strided_slice %12 {offsets = [0, 48], sizes = [16, 16], strides = [1, 1]} : vector<16x64xf32> to vector<16x16xf32>
    %87 = arith.truncf %86 : vector<16x16xf32> to vector<16x16xbf16>
    %cst_24 = arith.constant dense<0.000000e+00> : vector<16x16xf32>
    %88 = tpu.matmul %83, %85, %cst_24 {dimension_numbers = #tpu.dot_dimension_numbers<[1], [1], [0], [0], [0, 0, 1, 0], [], []>} : vector<16x16xbf16>, vector<16x16xbf16>, vector<16x16xf32> -> vector<16x16xf32>
    %cst_25 = arith.constant 2.500000e-01 : f32
    %89 = vector.broadcast %cst_25 : f32 to vector<16x16xf32>
    %90 = arith.mulf %88, %89 : vector<16x16xf32>
    %91 = vector.broadcast %3 : vector<1x16xf32> to vector<16x16xf32>
    %92 = arith.addf %90, %91 : vector<16x16xf32>
    %cst_26 = arith.constant dense<0xFF800000> : vector<16xf32>
    %93 = vector.multi_reduction <maximumf>, %92, %cst_26 [1] : vector<16x16xf32> to vector<16xf32>
    %94 = vector.shape_cast %93 : vector<16xf32> to vector<16x1xf32>
    %95 = vector.broadcast %94 : vector<16x1xf32> to vector<16x16xf32>
    %96 = arith.subf %92, %95 : vector<16x16xf32>
    %97 = math.exp %96 : vector<16x16xf32>
    %cst_27 = arith.constant dense<0.000000e+00> : vector<16xf32>
    %98 = vector.multi_reduction <add>, %97, %cst_27 [1] : vector<16x16xf32> to vector<16xf32>
    %99 = vector.shape_cast %98 : vector<16xf32> to vector<16x1xf32>
    %100 = tpu.reciprocal %99 {approx = true} : vector<16x1xf32> -> vector<16x1xf32>
    %101 = vector.broadcast %100 : vector<16x1xf32> to vector<16x16xf32>
    %102 = arith.mulf %97, %101 : vector<16x16xf32>
    %103 = arith.truncf %102 : vector<16x16xf32> to vector<16x16xbf16>
    %cst_28 = arith.constant dense<0.000000e+00> : vector<16x16xf32>
    %104 = tpu.matmul %103, %87, %cst_28 {dimension_numbers = #tpu.dot_dimension_numbers<[1], [0], [0], [1], [0, 0, 1, 1], [], []>} : vector<16x16xbf16>, vector<16x16xbf16>, vector<16x16xf32> -> vector<16x16xf32>
    %105 = tpu.concatenate %35, %58, %81, %104 in 1 : vector<16x16xf32>, vector<16x16xf32>, vector<16x16xf32>, vector<16x16xf32> -> vector<16x64xf32>
    %106 = arith.truncf %105 : vector<16x64xf32> to vector<16x64xbf16>
    %c0_29 = arith.constant 0 : index
    %c0_30 = arith.constant 0 : index
    %107 = vector.load %arg5[%c0_29, %c0_30] : memref<64x64xbf16, #tpu.memory_space<vmem>>, vector<64x64xbf16>
    %cst_31 = arith.constant dense<0.000000e+00> : vector<16x64xf32>
    %108 = tpu.matmul %106, %107, %cst_31 {dimension_numbers = #tpu.dot_dimension_numbers<[1], [0], [0], [1], [0, 0, 1, 1], [], []>} : vector<16x64xbf16>, vector<64x64xbf16>, vector<16x64xf32> -> vector<16x64xf32>
    %c0_32 = arith.constant 0 : index
    %c0_33 = arith.constant 0 : index
    %109 = vector.load %arg6[%c0_32, %c0_33] : memref<1x64xf32, #tpu.memory_space<vmem>>, vector<1x64xf32>
    %110 = vector.broadcast %109 : vector<1x64xf32> to vector<16x64xf32>
    %111 = arith.addf %108, %110 : vector<16x64xf32>
    %112 = arith.addf %1, %111 : vector<16x64xf32>
    %c0_34 = arith.constant 0 : index
    %c0_35 = arith.constant 0 : index
    %113 = vector.load %arg7[%c0_34, %c0_35] : memref<1x64xf32, #tpu.memory_space<vmem>>, vector<1x64xf32>
    %c0_36 = arith.constant 0 : index
    %c0_37 = arith.constant 0 : index
    %114 = vector.load %arg8[%c0_36, %c0_37] : memref<1x64xf32, #tpu.memory_space<vmem>>, vector<1x64xf32>
    %cst_38 = arith.constant dense<0.000000e+00> : vector<16xf32>
    %115 = vector.multi_reduction <add>, %112, %cst_38 [1] : vector<16x64xf32> to vector<16xf32>
    %116 = vector.shape_cast %115 : vector<16xf32> to vector<16x1xf32>
    %cst_39 = arith.constant 6.400000e+01 : f32
    %117 = vector.broadcast %cst_39 : f32 to vector<16x1xf32>
    %118 = arith.divf %116, %117 : vector<16x1xf32>
    %119 = vector.broadcast %118 : vector<16x1xf32> to vector<16x64xf32>
    %120 = arith.subf %112, %119 : vector<16x64xf32>
    %121 = arith.mulf %120, %120 : vector<16x64xf32>
    %cst_40 = arith.constant dense<0.000000e+00> : vector<16xf32>
    %122 = vector.multi_reduction <add>, %121, %cst_40 [1] : vector<16x64xf32> to vector<16xf32>
    %123 = vector.shape_cast %122 : vector<16xf32> to vector<16x1xf32>
    %cst_41 = arith.constant 6.400000e+01 : f32
    %124 = vector.broadcast %cst_41 : f32 to vector<16x1xf32>
    %125 = arith.divf %123, %124 : vector<16x1xf32>
    %126 = vector.broadcast %118 : vector<16x1xf32> to vector<16x64xf32>
    %127 = arith.subf %112, %126 : vector<16x64xf32>
    %cst_42 = arith.constant 9.99999996E-13 : f32
    %128 = vector.broadcast %cst_42 : f32 to vector<16x1xf32>
    %129 = arith.addf %125, %128 : vector<16x1xf32>
    %130 = math.rsqrt %129 : vector<16x1xf32>
    %131 = vector.broadcast %130 : vector<16x1xf32> to vector<16x64xf32>
    %132 = arith.mulf %127, %131 : vector<16x64xf32>
    %133 = vector.broadcast %113 : vector<1x64xf32> to vector<16x64xf32>
    %134 = arith.mulf %132, %133 : vector<16x64xf32>
    %135 = vector.broadcast %114 : vector<1x64xf32> to vector<16x64xf32>
    %136 = arith.addf %134, %135 : vector<16x64xf32>
    %137 = arith.truncf %136 : vector<16x64xf32> to vector<16x64xbf16>
    %c0_43 = arith.constant 0 : index
    %c0_44 = arith.constant 0 : index
    %138 = vector.load %arg9[%c0_43, %c0_44] : memref<64x128xbf16, #tpu.memory_space<vmem>>, vector<64x128xbf16>
    %cst_45 = arith.constant dense<0.000000e+00> : vector<16x128xf32>
    %139 = tpu.matmul %137, %138, %cst_45 {dimension_numbers = #tpu.dot_dimension_numbers<[1], [0], [0], [1], [0, 0, 1, 1], [], []>} : vector<16x64xbf16>, vector<64x128xbf16>, vector<16x128xf32> -> vector<16x128xf32>
    %c0_46 = arith.constant 0 : index
    %c0_47 = arith.constant 0 : index
    %140 = vector.load %arg10[%c0_46, %c0_47] : memref<1x128xf32, #tpu.memory_space<vmem>>, vector<1x128xf32>
    %141 = vector.broadcast %140 : vector<1x128xf32> to vector<16x128xf32>
    %142 = arith.addf %139, %141 : vector<16x128xf32>
    %143 = arith.mulf %142, %142 : vector<16x128xf32>
    %144 = arith.mulf %142, %143 : vector<16x128xf32>
    %cst_48 = arith.constant 4.471500e-02 : f32
    %145 = vector.broadcast %cst_48 : f32 to vector<16x128xf32>
    %146 = arith.mulf %145, %144 : vector<16x128xf32>
    %147 = arith.addf %142, %146 : vector<16x128xf32>
    %cst_49 = arith.constant 0.797884583 : f32
    %148 = vector.broadcast %cst_49 : f32 to vector<16x128xf32>
    %149 = arith.mulf %148, %147 : vector<16x128xf32>
    %150 = math.tanh %149 : vector<16x128xf32>
    %cst_50 = arith.constant 1.000000e+00 : f32
    %151 = vector.broadcast %cst_50 : f32 to vector<16x128xf32>
    %152 = arith.addf %151, %150 : vector<16x128xf32>
    %cst_51 = arith.constant 5.000000e-01 : f32
    %153 = vector.broadcast %cst_51 : f32 to vector<16x128xf32>
    %154 = arith.mulf %153, %152 : vector<16x128xf32>
    %155 = arith.mulf %142, %154 : vector<16x128xf32>
    %156 = arith.truncf %155 : vector<16x128xf32> to vector<16x128xbf16>
    %c0_52 = arith.constant 0 : index
    %c0_53 = arith.constant 0 : index
    %157 = vector.load %arg11[%c0_52, %c0_53] : memref<128x64xbf16, #tpu.memory_space<vmem>>, vector<128x64xbf16>
    %cst_54 = arith.constant dense<0.000000e+00> : vector<16x64xf32>
    %158 = tpu.matmul %156, %157, %cst_54 {dimension_numbers = #tpu.dot_dimension_numbers<[1], [0], [0], [1], [0, 0, 1, 1], [], []>} : vector<16x128xbf16>, vector<128x64xbf16>, vector<16x64xf32> -> vector<16x64xf32>
    %c0_55 = arith.constant 0 : index
    %c0_56 = arith.constant 0 : index
    %159 = vector.load %arg12[%c0_55, %c0_56] : memref<1x64xf32, #tpu.memory_space<vmem>>, vector<1x64xf32>
    %160 = vector.broadcast %159 : vector<1x64xf32> to vector<16x64xf32>
    %161 = arith.addf %158, %160 : vector<16x64xf32>
    %162 = arith.addf %136, %161 : vector<16x64xf32>
    %c0_57 = arith.constant 0 : index
    %c0_58 = arith.constant 0 : index
    %163 = vector.load %arg13[%c0_57, %c0_58] : memref<1x64xf32, #tpu.memory_space<vmem>>, vector<1x64xf32>
    %c0_59 = arith.constant 0 : index
    %c0_60 = arith.constant 0 : index
    %164 = vector.load %arg14[%c0_59, %c0_60] : memref<1x64xf32, #tpu.memory_space<vmem>>, vector<1x64xf32>
    %cst_61 = arith.constant dense<0.000000e+00> : vector<16xf32>
    %165 = vector.multi_reduction <add>, %162, %cst_61 [1] : vector<16x64xf32> to vector<16xf32>
    %166 = vector.shape_cast %165 : vector<16xf32> to vector<16x1xf32>
    %cst_62 = arith.constant 6.400000e+01 : f32
    %167 = vector.broadcast %cst_62 : f32 to vector<16x1xf32>
    %168 = arith.divf %166, %167 : vector<16x1xf32>
    %169 = vector.broadcast %168 : vector<16x1xf32> to vector<16x64xf32>
    %170 = arith.subf %162, %169 : vector<16x64xf32>
    %171 = arith.mulf %170, %170 : vector<16x64xf32>
    %cst_63 = arith.constant dense<0.000000e+00> : vector<16xf32>
    %172 = vector.multi_reduction <add>, %171, %cst_63 [1] : vector<16x64xf32> to vector<16xf32>
    %173 = vector.shape_cast %172 : vector<16xf32> to vector<16x1xf32>
    %cst_64 = arith.constant 6.400000e+01 : f32
    %174 = vector.broadcast %cst_64 : f32 to vector<16x1xf32>
    %175 = arith.divf %173, %174 : vector<16x1xf32>
    %176 = vector.broadcast %168 : vector<16x1xf32> to vector<16x64xf32>
    %177 = arith.subf %162, %176 : vector<16x64xf32>
    %cst_65 = arith.constant 9.99999996E-13 : f32
    %178 = vector.broadcast %cst_65 : f32 to vector<16x1xf32>
    %179 = arith.addf %175, %178 : vector<16x1xf32>
    %180 = math.rsqrt %179 : vector<16x1xf32>
    %181 = vector.broadcast %180 : vector<16x1xf32> to vector<16x64xf32>
    %182 = arith.mulf %177, %181 : vector<16x64xf32>
    %183 = vector.broadcast %163 : vector<1x64xf32> to vector<16x64xf32>
    %184 = arith.mulf %182, %183 : vector<16x64xf32>
    %185 = vector.broadcast %164 : vector<1x64xf32> to vector<16x64xf32>
    %186 = arith.addf %184, %185 : vector<16x64xf32>
    %c0_66 = arith.constant 0 : index
    %c0_67 = arith.constant 0 : index
    %c0_68 = arith.constant 0 : index
    %187 = vector.load %arg15[%c0_66, %c0_67, %c0_68] : memref<1x16x64xf32, #tpu.memory_space<vmem>>, vector<1x16x64xf32>
    %188 = vector.shape_cast %187 : vector<1x16x64xf32> to vector<16x64xf32>
    %189 = vector.shape_cast %186 : vector<16x64xf32> to vector<1x16x64xf32>
    tpu.vector_store %arg15[%c0_66, %c0_67, %c0_68], %189 {strides = array<i32>} : memref<1x16x64xf32, #tpu.memory_space<vmem>>, vector<1x16x64xf32>,
    return
  }
  func.func @transform_0(%arg0: i32) -> (i32, i32, i32) {
    %c0_i32 = arith.constant 0 : i32
    %c0_i32_0 = arith.constant 0 : i32
    %c0_i32_1 = arith.constant 0 : i32
    return %arg0, %c0_i32, %c0_i32_0 : i32, i32, i32
  }
  func.func @transform_1(%arg0: i32) -> (i32, i32, i32) {
    %c0_i32 = arith.constant 0 : i32
    %c0_i32_0 = arith.constant 0 : i32
    %c0_i32_1 = arith.constant 0 : i32
    return %arg0, %c0_i32, %c0_i32_0 : i32, i32, i32
  }
  func.func @transform_2(%arg0: i32) -> (i32, i32) {
    %c0_i32 = arith.constant 0 : i32
    %c0_i32_0 = arith.constant 0 : i32
    %c0_i32_1 = arith.constant 0 : i32
    return %c0_i32, %c0_i32_0 : i32, i32
  }
  func.func @transform_3(%arg0: i32) -> (i32, i32) {
    %c0_i32 = arith.constant 0 : i32
    %c0_i32_0 = arith.constant 0 : i32
    %c0_i32_1 = arith.constant 0 : i32
    return %c0_i32, %c0_i32_0 : i32, i32
  }
  func.func @transform_4(%arg0: i32) -> (i32, i32) {
    %c0_i32 = arith.constant 0 : i32
    %c0_i32_0 = arith.constant 0 : i32
    %c0_i32_1 = arith.constant 0 : i32
    return %c0_i32, %c0_i32_0 : i32, i32
  }
  func.func @transform_5(%arg0: i32) -> (i32, i32) {
    %c0_i32 = arith.constant 0 : i32
    %c0_i32_0 = arith.constant 0 : i32
    %c0_i32_1 = arith.constant 0 : i32
    return %c0_i32, %c0_i32_0 : i32, i32
  }
  func.func @transform_6(%arg0: i32) -> (i32, i32) {
    %c0_i32 = arith.constant 0 : i32
    %c0_i32_0 = arith.constant 0 : i32
    %c0_i32_1 = arith.constant 0 : i32
    return %c0_i32, %c0_i32_0 : i32, i32
  }
  func.func @transform_7(%arg0: i32) -> (i32, i32) {
    %c0_i32 = arith.constant 0 : i32
    %c0_i32_0 = arith.constant 0 : i32
    %c0_i32_1 = arith.constant 0 : i32
    return %c0_i32, %c0_i32_0 : i32, i32
  }
  func.func @transform_8(%arg0: i32) -> (i32, i32) {
    %c0_i32 = arith.constant 0 : i32
    %c0_i32_0 = arith.constant 0 : i32
    %c0_i32_1 = arith.constant 0 : i32
    return %c0_i32, %c0_i32_0 : i32, i32
  }
  func.func @transform_9(%arg0: i32) -> (i32, i32) {
    %c0_i32 = arith.constant 0 : i32
    %c0_i32_0 = arith.constant 0 : i32
    %c0_i32_1 = arith.constant 0 : i32
    return %c0_i32, %c0_i32_0 : i32, i32
  }
  func.func @transform_10(%arg0: i32) -> (i32, i32) {
    %c0_i32 = arith.constant 0 : i32
    %c0_i32_0 = arith.constant 0 : i32
    %c0_i32_1 = arith.constant 0 : i32
    return %c0_i32, %c0_i32_0 : i32, i32
  }
  func.func @transform_11(%arg0: i32) -> (i32, i32) {
    %c0_i32 = arith.constant 0 : i32
    %c0_i32_0 = arith.constant 0 : i32
    %c0_i32_1 = arith.constant 0 : i32
    return %c0_i32, %c0_i32_0 : i32, i32
  }
  func.func @transform_12(%arg0: i32) -> (i32, i32) {
    %c0_i32 = arith.constant 0 : i32
    %c0_i32_0 = arith.constant 0 : i32
    %c0_i32_1 = arith.constant 0 : i32
    return %c0_i32, %c0_i32_0 : i32, i32
  }
  func.func @transform_13(%arg0: i32) -> (i32, i32) {
    %c0_i32 = arith.constant 0 : i32
    %c0_i32_0 = arith.constant 0 : i32
    %c0_i32_1 = arith.constant 0 : i32
    return %c0_i32, %c0_i32_0 : i32, i32
  }
  func.func @transform_14(%arg0: i32) -> (i32, i32, i32) {
    %c0_i32 = arith.constant 0 : i32
    %c0_i32_0 = arith.constant 0 : i32
    %c0_i32_1 = arith.constant 0 : i32
    return %arg0, %c0_i32, %c0_i32_0 : i32, i32, i32
  }
}

module attributes {stable_mosaic.version = 11 : i64} {
  func.func @_embed_fmt_ln_kernel(%arg0: i32, %arg1: memref<32x64xf32, #tpu.memory_space<vmem>>, %arg2: memref<32x11xf32, #tpu.memory_space<vmem>>, %arg3: memref<11x64xbf16, #tpu.memory_space<vmem>>, %arg4: memref<1x64xf32, #tpu.memory_space<vmem>>, %arg5: memref<1x64xf32, #tpu.memory_space<vmem>>, %arg6: memref<1x64xf32, #tpu.memory_space<vmem>>, %arg7: memref<32x64xf32, #tpu.memory_space<vmem>>) attributes {dimension_semantics = [#tpu.dimension_semantics<parallel>], iteration_bounds = array<i64: 1>, scalar_prefetch = 0 : i64, scratch_operands = 0 : i64, tpu.core_type = #tpu.core_type<tc>, window_params = [{transform_indices = @transform_0, window_bounds = array<i64: 32, 64>}, {transform_indices = @transform_1, window_bounds = array<i64: 32, 11>}, {pipeline_mode = #tpu.pipeline_mode<synchronous>, transform_indices = @transform_2, window_bounds = array<i64: 11, 64>}, {pipeline_mode = #tpu.pipeline_mode<synchronous>, transform_indices = @transform_3, window_bounds = array<i64: 1, 64>}, {pipeline_mode = #tpu.pipeline_mode<synchronous>, transform_indices = @transform_4, window_bounds = array<i64: 1, 64>}, {pipeline_mode = #tpu.pipeline_mode<synchronous>, transform_indices = @transform_5, window_bounds = array<i64: 1, 64>}, {transform_indices = @transform_6, window_bounds = array<i64: 32, 64>}]} {
    %c0 = arith.constant 0 : index
    %c0_0 = arith.constant 0 : index
    %0 = vector.load %arg2[%c0, %c0_0] : memref<32x11xf32, #tpu.memory_space<vmem>>, vector<32x11xf32>
    %1 = arith.truncf %0 : vector<32x11xf32> to vector<32x11xbf16>
    %c0_1 = arith.constant 0 : index
    %c0_2 = arith.constant 0 : index
    %2 = vector.load %arg3[%c0_1, %c0_2] : memref<11x64xbf16, #tpu.memory_space<vmem>>, vector<11x64xbf16>
    %cst = arith.constant dense<0.000000e+00> : vector<32x64xf32>
    %3 = tpu.matmul %1, %2, %cst {dimension_numbers = #tpu.dot_dimension_numbers<[1], [0], [0], [1], [0, 0, 1, 1], [], []>} : vector<32x11xbf16>, vector<11x64xbf16>, vector<32x64xf32> -> vector<32x64xf32>
    %c0_3 = arith.constant 0 : index
    %c0_4 = arith.constant 0 : index
    %4 = vector.load %arg4[%c0_3, %c0_4] : memref<1x64xf32, #tpu.memory_space<vmem>>, vector<1x64xf32>
    %5 = vector.broadcast %4 : vector<1x64xf32> to vector<32x64xf32>
    %6 = arith.addf %3, %5 : vector<32x64xf32>
    %c0_5 = arith.constant 0 : index
    %c0_6 = arith.constant 0 : index
    %7 = vector.load %arg1[%c0_5, %c0_6] : memref<32x64xf32, #tpu.memory_space<vmem>>, vector<32x64xf32>
    %8 = arith.addf %7, %6 : vector<32x64xf32>
    %c0_7 = arith.constant 0 : index
    %c0_8 = arith.constant 0 : index
    %9 = vector.load %arg5[%c0_7, %c0_8] : memref<1x64xf32, #tpu.memory_space<vmem>>, vector<1x64xf32>
    %c0_9 = arith.constant 0 : index
    %c0_10 = arith.constant 0 : index
    %10 = vector.load %arg6[%c0_9, %c0_10] : memref<1x64xf32, #tpu.memory_space<vmem>>, vector<1x64xf32>
    %cst_11 = arith.constant dense<0.000000e+00> : vector<32xf32>
    %11 = vector.multi_reduction <add>, %8, %cst_11 [1] : vector<32x64xf32> to vector<32xf32>
    %12 = vector.shape_cast %11 : vector<32xf32> to vector<32x1xf32>
    %cst_12 = arith.constant 6.400000e+01 : f32
    %13 = vector.broadcast %cst_12 : f32 to vector<32x1xf32>
    %14 = arith.divf %12, %13 : vector<32x1xf32>
    %15 = vector.broadcast %14 : vector<32x1xf32> to vector<32x64xf32>
    %16 = arith.subf %8, %15 : vector<32x64xf32>
    %17 = arith.mulf %16, %16 : vector<32x64xf32>
    %cst_13 = arith.constant dense<0.000000e+00> : vector<32xf32>
    %18 = vector.multi_reduction <add>, %17, %cst_13 [1] : vector<32x64xf32> to vector<32xf32>
    %19 = vector.shape_cast %18 : vector<32xf32> to vector<32x1xf32>
    %cst_14 = arith.constant 6.400000e+01 : f32
    %20 = vector.broadcast %cst_14 : f32 to vector<32x1xf32>
    %21 = arith.divf %19, %20 : vector<32x1xf32>
    %22 = vector.broadcast %14 : vector<32x1xf32> to vector<32x64xf32>
    %23 = arith.subf %8, %22 : vector<32x64xf32>
    %cst_15 = arith.constant 9.99999996E-13 : f32
    %24 = vector.broadcast %cst_15 : f32 to vector<32x1xf32>
    %25 = arith.addf %21, %24 : vector<32x1xf32>
    %26 = math.rsqrt %25 : vector<32x1xf32>
    %27 = vector.broadcast %26 : vector<32x1xf32> to vector<32x64xf32>
    %28 = arith.mulf %23, %27 : vector<32x64xf32>
    %29 = vector.broadcast %9 : vector<1x64xf32> to vector<32x64xf32>
    %30 = arith.mulf %28, %29 : vector<32x64xf32>
    %31 = vector.broadcast %10 : vector<1x64xf32> to vector<32x64xf32>
    %32 = arith.addf %30, %31 : vector<32x64xf32>
    %c0_16 = arith.constant 0 : index
    %c0_17 = arith.constant 0 : index
    %33 = vector.load %arg7[%c0_16, %c0_17] : memref<32x64xf32, #tpu.memory_space<vmem>>, vector<32x64xf32>
    tpu.vector_store %arg7[%c0_16, %c0_17], %32 {strides = array<i32>} : memref<32x64xf32, #tpu.memory_space<vmem>>, vector<32x64xf32>,
    return
  }
  func.func @transform_0(%arg0: i32) -> (i32, i32) {
    %c0_i32 = arith.constant 0 : i32
    %c0_i32_0 = arith.constant 0 : i32
    return %arg0, %c0_i32 : i32, i32
  }
  func.func @transform_1(%arg0: i32) -> (i32, i32) {
    %c0_i32 = arith.constant 0 : i32
    %c0_i32_0 = arith.constant 0 : i32
    return %arg0, %c0_i32 : i32, i32
  }
  func.func @transform_2(%arg0: i32) -> (i32, i32) {
    %c0_i32 = arith.constant 0 : i32
    %c0_i32_0 = arith.constant 0 : i32
    %c0_i32_1 = arith.constant 0 : i32
    return %c0_i32, %c0_i32_0 : i32, i32
  }
  func.func @transform_3(%arg0: i32) -> (i32, i32) {
    %c0_i32 = arith.constant 0 : i32
    %c0_i32_0 = arith.constant 0 : i32
    %c0_i32_1 = arith.constant 0 : i32
    return %c0_i32, %c0_i32_0 : i32, i32
  }
  func.func @transform_4(%arg0: i32) -> (i32, i32) {
    %c0_i32 = arith.constant 0 : i32
    %c0_i32_0 = arith.constant 0 : i32
    %c0_i32_1 = arith.constant 0 : i32
    return %c0_i32, %c0_i32_0 : i32, i32
  }
  func.func @transform_5(%arg0: i32) -> (i32, i32) {
    %c0_i32 = arith.constant 0 : i32
    %c0_i32_0 = arith.constant 0 : i32
    %c0_i32_1 = arith.constant 0 : i32
    return %c0_i32, %c0_i32_0 : i32, i32
  }
  func.func @transform_6(%arg0: i32) -> (i32, i32) {
    %c0_i32 = arith.constant 0 : i32
    %c0_i32_0 = arith.constant 0 : i32
    return %arg0, %c0_i32 : i32, i32
  }
}

module attributes {stable_mosaic.version = 11 : i64} {
  func.func @_heads_kernel(%arg0: i32, %arg1: memref<32x64xf32, #tpu.memory_space<vmem>>, %arg2: memref<64x64xbf16, #tpu.memory_space<vmem>>, %arg3: memref<1x64xf32, #tpu.memory_space<vmem>>, %arg4: memref<1x64xf32, #tpu.memory_space<vmem>>, %arg5: memref<1x64xf32, #tpu.memory_space<vmem>>, %arg6: memref<64x256xbf16, #tpu.memory_space<vmem>>, %arg7: memref<1x256xf32, #tpu.memory_space<vmem>>, %arg8: memref<64x64xbf16, #tpu.memory_space<vmem>>, %arg9: memref<1x64xf32, #tpu.memory_space<vmem>>, %arg10: memref<1x64xf32, #tpu.memory_space<vmem>>, %arg11: memref<1x64xf32, #tpu.memory_space<vmem>>, %arg12: memref<64x128xbf16, #tpu.memory_space<vmem>>, %arg13: memref<1x128xf32, #tpu.memory_space<vmem>>, %arg14: memref<64x128xbf16, #tpu.memory_space<vmem>>, %arg15: memref<1x128xf32, #tpu.memory_space<vmem>>, %arg16: memref<32x256xf32, #tpu.memory_space<vmem>>, %arg17: memref<32x128xf32, #tpu.memory_space<vmem>>, %arg18: memref<32x128xf32, #tpu.memory_space<vmem>>) attributes {dimension_semantics = [#tpu.dimension_semantics<parallel>], iteration_bounds = array<i64: 1>, scalar_prefetch = 0 : i64, scratch_operands = 0 : i64, tpu.core_type = #tpu.core_type<tc>, window_params = [{transform_indices = @transform_0, window_bounds = array<i64: 32, 64>}, {pipeline_mode = #tpu.pipeline_mode<synchronous>, transform_indices = @transform_1, window_bounds = array<i64: 64, 64>}, {pipeline_mode = #tpu.pipeline_mode<synchronous>, transform_indices = @transform_2, window_bounds = array<i64: 1, 64>}, {pipeline_mode = #tpu.pipeline_mode<synchronous>, transform_indices = @transform_3, window_bounds = array<i64: 1, 64>}, {pipeline_mode = #tpu.pipeline_mode<synchronous>, transform_indices = @transform_4, window_bounds = array<i64: 1, 64>}, {pipeline_mode = #tpu.pipeline_mode<synchronous>, transform_indices = @transform_5, window_bounds = array<i64: 64, 256>}, {pipeline_mode = #tpu.pipeline_mode<synchronous>, transform_indices = @transform_6, window_bounds = array<i64: 1, 256>}, {pipeline_mode = #tpu.pipeline_mode<synchronous>, transform_indices = @transform_7, window_bounds = array<i64: 64, 64>}, {pipeline_mode = #tpu.pipeline_mode<synchronous>, transform_indices = @transform_8, window_bounds = array<i64: 1, 64>}, {pipeline_mode = #tpu.pipeline_mode<synchronous>, transform_indices = @transform_9, window_bounds = array<i64: 1, 64>}, {pipeline_mode = #tpu.pipeline_mode<synchronous>, transform_indices = @transform_10, window_bounds = array<i64: 1, 64>}, {pipeline_mode = #tpu.pipeline_mode<synchronous>, transform_indices = @transform_11, window_bounds = array<i64: 64, 128>}, {pipeline_mode = #tpu.pipeline_mode<synchronous>, transform_indices = @transform_12, window_bounds = array<i64: 1, 128>}, {pipeline_mode = #tpu.pipeline_mode<synchronous>, transform_indices = @transform_13, window_bounds = array<i64: 64, 128>}, {pipeline_mode = #tpu.pipeline_mode<synchronous>, transform_indices = @transform_14, window_bounds = array<i64: 1, 128>}, {transform_indices = @transform_15, window_bounds = array<i64: 32, 256>}, {transform_indices = @transform_16, window_bounds = array<i64: 32, 128>}, {transform_indices = @transform_17, window_bounds = array<i64: 32, 128>}]} {
    %c0 = arith.constant 0 : index
    %c0_0 = arith.constant 0 : index
    %0 = vector.load %arg1[%c0, %c0_0] : memref<32x64xf32, #tpu.memory_space<vmem>>, vector<32x64xf32>
    %1 = arith.truncf %0 : vector<32x64xf32> to vector<32x64xbf16>
    %c0_1 = arith.constant 0 : index
    %c0_2 = arith.constant 0 : index
    %2 = vector.load %arg2[%c0_1, %c0_2] : memref<64x64xbf16, #tpu.memory_space<vmem>>, vector<64x64xbf16>
    %cst = arith.constant dense<0.000000e+00> : vector<32x64xf32>
    %3 = tpu.matmul %1, %2, %cst {dimension_numbers = #tpu.dot_dimension_numbers<[1], [0], [0], [1], [0, 0, 1, 1], [], []>} : vector<32x64xbf16>, vector<64x64xbf16>, vector<32x64xf32> -> vector<32x64xf32>
    %c0_3 = arith.constant 0 : index
    %c0_4 = arith.constant 0 : index
    %4 = vector.load %arg3[%c0_3, %c0_4] : memref<1x64xf32, #tpu.memory_space<vmem>>, vector<1x64xf32>
    %5 = vector.broadcast %4 : vector<1x64xf32> to vector<32x64xf32>
    %6 = arith.addf %3, %5 : vector<32x64xf32>
    %7 = arith.mulf %6, %6 : vector<32x64xf32>
    %8 = arith.mulf %6, %7 : vector<32x64xf32>
    %cst_5 = arith.constant 4.471500e-02 : f32
    %9 = vector.broadcast %cst_5 : f32 to vector<32x64xf32>
    %10 = arith.mulf %9, %8 : vector<32x64xf32>
    %11 = arith.addf %6, %10 : vector<32x64xf32>
    %cst_6 = arith.constant 0.797884583 : f32
    %12 = vector.broadcast %cst_6 : f32 to vector<32x64xf32>
    %13 = arith.mulf %12, %11 : vector<32x64xf32>
    %14 = math.tanh %13 : vector<32x64xf32>
    %cst_7 = arith.constant 1.000000e+00 : f32
    %15 = vector.broadcast %cst_7 : f32 to vector<32x64xf32>
    %16 = arith.addf %15, %14 : vector<32x64xf32>
    %cst_8 = arith.constant 5.000000e-01 : f32
    %17 = vector.broadcast %cst_8 : f32 to vector<32x64xf32>
    %18 = arith.mulf %17, %16 : vector<32x64xf32>
    %19 = arith.mulf %6, %18 : vector<32x64xf32>
    %c0_9 = arith.constant 0 : index
    %c0_10 = arith.constant 0 : index
    %20 = vector.load %arg4[%c0_9, %c0_10] : memref<1x64xf32, #tpu.memory_space<vmem>>, vector<1x64xf32>
    %c0_11 = arith.constant 0 : index
    %c0_12 = arith.constant 0 : index
    %21 = vector.load %arg5[%c0_11, %c0_12] : memref<1x64xf32, #tpu.memory_space<vmem>>, vector<1x64xf32>
    %cst_13 = arith.constant dense<0.000000e+00> : vector<32xf32>
    %22 = vector.multi_reduction <add>, %19, %cst_13 [1] : vector<32x64xf32> to vector<32xf32>
    %23 = vector.shape_cast %22 : vector<32xf32> to vector<32x1xf32>
    %cst_14 = arith.constant 6.400000e+01 : f32
    %24 = vector.broadcast %cst_14 : f32 to vector<32x1xf32>
    %25 = arith.divf %23, %24 : vector<32x1xf32>
    %26 = vector.broadcast %25 : vector<32x1xf32> to vector<32x64xf32>
    %27 = arith.subf %19, %26 : vector<32x64xf32>
    %28 = arith.mulf %27, %27 : vector<32x64xf32>
    %cst_15 = arith.constant dense<0.000000e+00> : vector<32xf32>
    %29 = vector.multi_reduction <add>, %28, %cst_15 [1] : vector<32x64xf32> to vector<32xf32>
    %30 = vector.shape_cast %29 : vector<32xf32> to vector<32x1xf32>
    %cst_16 = arith.constant 6.400000e+01 : f32
    %31 = vector.broadcast %cst_16 : f32 to vector<32x1xf32>
    %32 = arith.divf %30, %31 : vector<32x1xf32>
    %33 = vector.broadcast %25 : vector<32x1xf32> to vector<32x64xf32>
    %34 = arith.subf %19, %33 : vector<32x64xf32>
    %cst_17 = arith.constant 9.99999996E-13 : f32
    %35 = vector.broadcast %cst_17 : f32 to vector<32x1xf32>
    %36 = arith.addf %32, %35 : vector<32x1xf32>
    %37 = math.rsqrt %36 : vector<32x1xf32>
    %38 = vector.broadcast %37 : vector<32x1xf32> to vector<32x64xf32>
    %39 = arith.mulf %34, %38 : vector<32x64xf32>
    %40 = vector.broadcast %20 : vector<1x64xf32> to vector<32x64xf32>
    %41 = arith.mulf %39, %40 : vector<32x64xf32>
    %42 = vector.broadcast %21 : vector<1x64xf32> to vector<32x64xf32>
    %43 = arith.addf %41, %42 : vector<32x64xf32>
    %44 = arith.truncf %43 : vector<32x64xf32> to vector<32x64xbf16>
    %c0_18 = arith.constant 0 : index
    %c0_19 = arith.constant 0 : index
    %45 = vector.load %arg6[%c0_18, %c0_19] : memref<64x256xbf16, #tpu.memory_space<vmem>>, vector<64x256xbf16>
    %cst_20 = arith.constant dense<0.000000e+00> : vector<32x256xf32>
    %46 = tpu.matmul %44, %45, %cst_20 {dimension_numbers = #tpu.dot_dimension_numbers<[1], [0], [0], [1], [0, 0, 1, 1], [], []>} : vector<32x64xbf16>, vector<64x256xbf16>, vector<32x256xf32> -> vector<32x256xf32>
    %c0_21 = arith.constant 0 : index
    %c0_22 = arith.constant 0 : index
    %47 = vector.load %arg7[%c0_21, %c0_22] : memref<1x256xf32, #tpu.memory_space<vmem>>, vector<1x256xf32>
    %48 = vector.broadcast %47 : vector<1x256xf32> to vector<32x256xf32>
    %49 = arith.addf %46, %48 : vector<32x256xf32>
    %c0_23 = arith.constant 0 : index
    %c0_24 = arith.constant 0 : index
    %50 = vector.load %arg16[%c0_23, %c0_24] : memref<32x256xf32, #tpu.memory_space<vmem>>, vector<32x256xf32>
    tpu.vector_store %arg16[%c0_23, %c0_24], %49 {strides = array<i32>} : memref<32x256xf32, #tpu.memory_space<vmem>>, vector<32x256xf32>,
    %c0_25 = arith.constant 0 : index
    %c0_26 = arith.constant 0 : index
    %51 = vector.load %arg8[%c0_25, %c0_26] : memref<64x64xbf16, #tpu.memory_space<vmem>>, vector<64x64xbf16>
    %cst_27 = arith.constant dense<0.000000e+00> : vector<32x64xf32>
    %52 = tpu.matmul %1, %51, %cst_27 {dimension_numbers = #tpu.dot_dimension_numbers<[1], [0], [0], [1], [0, 0, 1, 1], [], []>} : vector<32x64xbf16>, vector<64x64xbf16>, vector<32x64xf32> -> vector<32x64xf32>
    %c0_28 = arith.constant 0 : index
    %c0_29 = arith.constant 0 : index
    %53 = vector.load %arg9[%c0_28, %c0_29] : memref<1x64xf32, #tpu.memory_space<vmem>>, vector<1x64xf32>
    %54 = vector.broadcast %53 : vector<1x64xf32> to vector<32x64xf32>
    %55 = arith.addf %52, %54 : vector<32x64xf32>
    %56 = arith.mulf %55, %55 : vector<32x64xf32>
    %57 = arith.mulf %55, %56 : vector<32x64xf32>
    %cst_30 = arith.constant 4.471500e-02 : f32
    %58 = vector.broadcast %cst_30 : f32 to vector<32x64xf32>
    %59 = arith.mulf %58, %57 : vector<32x64xf32>
    %60 = arith.addf %55, %59 : vector<32x64xf32>
    %cst_31 = arith.constant 0.797884583 : f32
    %61 = vector.broadcast %cst_31 : f32 to vector<32x64xf32>
    %62 = arith.mulf %61, %60 : vector<32x64xf32>
    %63 = math.tanh %62 : vector<32x64xf32>
    %cst_32 = arith.constant 1.000000e+00 : f32
    %64 = vector.broadcast %cst_32 : f32 to vector<32x64xf32>
    %65 = arith.addf %64, %63 : vector<32x64xf32>
    %cst_33 = arith.constant 5.000000e-01 : f32
    %66 = vector.broadcast %cst_33 : f32 to vector<32x64xf32>
    %67 = arith.mulf %66, %65 : vector<32x64xf32>
    %68 = arith.mulf %55, %67 : vector<32x64xf32>
    %c0_34 = arith.constant 0 : index
    %c0_35 = arith.constant 0 : index
    %69 = vector.load %arg10[%c0_34, %c0_35] : memref<1x64xf32, #tpu.memory_space<vmem>>, vector<1x64xf32>
    %c0_36 = arith.constant 0 : index
    %c0_37 = arith.constant 0 : index
    %70 = vector.load %arg11[%c0_36, %c0_37] : memref<1x64xf32, #tpu.memory_space<vmem>>, vector<1x64xf32>
    %cst_38 = arith.constant dense<0.000000e+00> : vector<32xf32>
    %71 = vector.multi_reduction <add>, %68, %cst_38 [1] : vector<32x64xf32> to vector<32xf32>
    %72 = vector.shape_cast %71 : vector<32xf32> to vector<32x1xf32>
    %cst_39 = arith.constant 6.400000e+01 : f32
    %73 = vector.broadcast %cst_39 : f32 to vector<32x1xf32>
    %74 = arith.divf %72, %73 : vector<32x1xf32>
    %75 = vector.broadcast %74 : vector<32x1xf32> to vector<32x64xf32>
    %76 = arith.subf %68, %75 : vector<32x64xf32>
    %77 = arith.mulf %76, %76 : vector<32x64xf32>
    %cst_40 = arith.constant dense<0.000000e+00> : vector<32xf32>
    %78 = vector.multi_reduction <add>, %77, %cst_40 [1] : vector<32x64xf32> to vector<32xf32>
    %79 = vector.shape_cast %78 : vector<32xf32> to vector<32x1xf32>
    %cst_41 = arith.constant 6.400000e+01 : f32
    %80 = vector.broadcast %cst_41 : f32 to vector<32x1xf32>
    %81 = arith.divf %79, %80 : vector<32x1xf32>
    %82 = vector.broadcast %74 : vector<32x1xf32> to vector<32x64xf32>
    %83 = arith.subf %68, %82 : vector<32x64xf32>
    %cst_42 = arith.constant 9.99999996E-13 : f32
    %84 = vector.broadcast %cst_42 : f32 to vector<32x1xf32>
    %85 = arith.addf %81, %84 : vector<32x1xf32>
    %86 = math.rsqrt %85 : vector<32x1xf32>
    %87 = vector.broadcast %86 : vector<32x1xf32> to vector<32x64xf32>
    %88 = arith.mulf %83, %87 : vector<32x64xf32>
    %89 = vector.broadcast %69 : vector<1x64xf32> to vector<32x64xf32>
    %90 = arith.mulf %88, %89 : vector<32x64xf32>
    %91 = vector.broadcast %70 : vector<1x64xf32> to vector<32x64xf32>
    %92 = arith.addf %90, %91 : vector<32x64xf32>
    %93 = arith.truncf %92 : vector<32x64xf32> to vector<32x64xbf16>
    %c0_43 = arith.constant 0 : index
    %c0_44 = arith.constant 0 : index
    %94 = vector.load %arg12[%c0_43, %c0_44] : memref<64x128xbf16, #tpu.memory_space<vmem>>, vector<64x128xbf16>
    %cst_45 = arith.constant dense<0.000000e+00> : vector<32x128xf32>
    %95 = tpu.matmul %93, %94, %cst_45 {dimension_numbers = #tpu.dot_dimension_numbers<[1], [0], [0], [1], [0, 0, 1, 1], [], []>} : vector<32x64xbf16>, vector<64x128xbf16>, vector<32x128xf32> -> vector<32x128xf32>
    %c0_46 = arith.constant 0 : index
    %c0_47 = arith.constant 0 : index
    %96 = vector.load %arg13[%c0_46, %c0_47] : memref<1x128xf32, #tpu.memory_space<vmem>>, vector<1x128xf32>
    %97 = vector.broadcast %96 : vector<1x128xf32> to vector<32x128xf32>
    %98 = arith.addf %95, %97 : vector<32x128xf32>
    %c0_48 = arith.constant 0 : index
    %c0_49 = arith.constant 0 : index
    %99 = vector.load %arg17[%c0_48, %c0_49] : memref<32x128xf32, #tpu.memory_space<vmem>>, vector<32x128xf32>
    tpu.vector_store %arg17[%c0_48, %c0_49], %98 {strides = array<i32>} : memref<32x128xf32, #tpu.memory_space<vmem>>, vector<32x128xf32>,
    %c0_50 = arith.constant 0 : index
    %c0_51 = arith.constant 0 : index
    %100 = vector.load %arg14[%c0_50, %c0_51] : memref<64x128xbf16, #tpu.memory_space<vmem>>, vector<64x128xbf16>
    %cst_52 = arith.constant dense<0.000000e+00> : vector<32x128xf32>
    %101 = tpu.matmul %1, %100, %cst_52 {dimension_numbers = #tpu.dot_dimension_numbers<[1], [0], [0], [1], [0, 0, 1, 1], [], []>} : vector<32x64xbf16>, vector<64x128xbf16>, vector<32x128xf32> -> vector<32x128xf32>
    %c0_53 = arith.constant 0 : index
    %c0_54 = arith.constant 0 : index
    %102 = vector.load %arg15[%c0_53, %c0_54] : memref<1x128xf32, #tpu.memory_space<vmem>>, vector<1x128xf32>
    %103 = vector.broadcast %102 : vector<1x128xf32> to vector<32x128xf32>
    %104 = arith.addf %101, %103 : vector<32x128xf32>
    %c0_55 = arith.constant 0 : index
    %c0_56 = arith.constant 0 : index
    %105 = vector.load %arg18[%c0_55, %c0_56] : memref<32x128xf32, #tpu.memory_space<vmem>>, vector<32x128xf32>
    tpu.vector_store %arg18[%c0_55, %c0_56], %104 {strides = array<i32>} : memref<32x128xf32, #tpu.memory_space<vmem>>, vector<32x128xf32>,
    return
  }
  func.func @transform_0(%arg0: i32) -> (i32, i32) {
    %c0_i32 = arith.constant 0 : i32
    %c0_i32_0 = arith.constant 0 : i32
    return %arg0, %c0_i32 : i32, i32
  }
  func.func @transform_1(%arg0: i32) -> (i32, i32) {
    %c0_i32 = arith.constant 0 : i32
    %c0_i32_0 = arith.constant 0 : i32
    %c0_i32_1 = arith.constant 0 : i32
    return %c0_i32, %c0_i32_0 : i32, i32
  }
  func.func @transform_2(%arg0: i32) -> (i32, i32) {
    %c0_i32 = arith.constant 0 : i32
    %c0_i32_0 = arith.constant 0 : i32
    %c0_i32_1 = arith.constant 0 : i32
    return %c0_i32, %c0_i32_0 : i32, i32
  }
  func.func @transform_3(%arg0: i32) -> (i32, i32) {
    %c0_i32 = arith.constant 0 : i32
    %c0_i32_0 = arith.constant 0 : i32
    %c0_i32_1 = arith.constant 0 : i32
    return %c0_i32, %c0_i32_0 : i32, i32
  }
  func.func @transform_4(%arg0: i32) -> (i32, i32) {
    %c0_i32 = arith.constant 0 : i32
    %c0_i32_0 = arith.constant 0 : i32
    %c0_i32_1 = arith.constant 0 : i32
    return %c0_i32, %c0_i32_0 : i32, i32
  }
  func.func @transform_5(%arg0: i32) -> (i32, i32) {
    %c0_i32 = arith.constant 0 : i32
    %c0_i32_0 = arith.constant 0 : i32
    %c0_i32_1 = arith.constant 0 : i32
    return %c0_i32, %c0_i32_0 : i32, i32
  }
  func.func @transform_6(%arg0: i32) -> (i32, i32) {
    %c0_i32 = arith.constant 0 : i32
    %c0_i32_0 = arith.constant 0 : i32
    %c0_i32_1 = arith.constant 0 : i32
    return %c0_i32, %c0_i32_0 : i32, i32
  }
  func.func @transform_7(%arg0: i32) -> (i32, i32) {
    %c0_i32 = arith.constant 0 : i32
    %c0_i32_0 = arith.constant 0 : i32
    %c0_i32_1 = arith.constant 0 : i32
    return %c0_i32, %c0_i32_0 : i32, i32
  }
  func.func @transform_8(%arg0: i32) -> (i32, i32) {
    %c0_i32 = arith.constant 0 : i32
    %c0_i32_0 = arith.constant 0 : i32
    %c0_i32_1 = arith.constant 0 : i32
    return %c0_i32, %c0_i32_0 : i32, i32
  }
  func.func @transform_9(%arg0: i32) -> (i32, i32) {
    %c0_i32 = arith.constant 0 : i32
    %c0_i32_0 = arith.constant 0 : i32
    %c0_i32_1 = arith.constant 0 : i32
    return %c0_i32, %c0_i32_0 : i32, i32
  }
  func.func @transform_10(%arg0: i32) -> (i32, i32) {
    %c0_i32 = arith.constant 0 : i32
    %c0_i32_0 = arith.constant 0 : i32
    %c0_i32_1 = arith.constant 0 : i32
    return %c0_i32, %c0_i32_0 : i32, i32
  }
  func.func @transform_11(%arg0: i32) -> (i32, i32) {
    %c0_i32 = arith.constant 0 : i32
    %c0_i32_0 = arith.constant 0 : i32
    %c0_i32_1 = arith.constant 0 : i32
    return %c0_i32, %c0_i32_0 : i32, i32
  }
  func.func @transform_12(%arg0: i32) -> (i32, i32) {
    %c0_i32 = arith.constant 0 : i32
    %c0_i32_0 = arith.constant 0 : i32
    %c0_i32_1 = arith.constant 0 : i32
    return %c0_i32, %c0_i32_0 : i32, i32
  }
  func.func @transform_13(%arg0: i32) -> (i32, i32) {
    %c0_i32 = arith.constant 0 : i32
    %c0_i32_0 = arith.constant 0 : i32
    %c0_i32_1 = arith.constant 0 : i32
    return %c0_i32, %c0_i32_0 : i32, i32
  }
  func.func @transform_14(%arg0: i32) -> (i32, i32) {
    %c0_i32 = arith.constant 0 : i32
    %c0_i32_0 = arith.constant 0 : i32
    %c0_i32_1 = arith.constant 0 : i32
    return %c0_i32, %c0_i32_0 : i32, i32
  }
  func.func @transform_15(%arg0: i32) -> (i32, i32) {
    %c0_i32 = arith.constant 0 : i32
    %c0_i32_0 = arith.constant 0 : i32
    return %arg0, %c0_i32 : i32, i32
  }
  func.func @transform_16(%arg0: i32) -> (i32, i32) {
    %c0_i32 = arith.constant 0 : i32
    %c0_i32_0 = arith.constant 0 : i32
    return %arg0, %c0_i32 : i32, i32
  }
  func.func @transform_17(%arg0: i32) -> (i32, i32) {
    %c0_i32 = arith.constant 0 : i32
    %c0_i32_0 = arith.constant 0 : i32
    return %arg0, %c0_i32 : i32, i32
  }
}

module attributes {stable_mosaic.version = 11 : i64} {
  func.func @_pointer_kernel(%arg0: i32, %arg1: memref<1x16x64xf32, #tpu.memory_space<vmem>>, %arg2: memref<64x128xbf16, #tpu.memory_space<vmem>>, %arg3: memref<1x128xf32, #tpu.memory_space<vmem>>, %arg4: memref<1x1x16xf32, #tpu.memory_space<vmem>>, %arg5: memref<1x16x16xf32, #tpu.memory_space<vmem>>) attributes {dimension_semantics = [#tpu.dimension_semantics<parallel>], iteration_bounds = array<i64: 2>, scalar_prefetch = 0 : i64, scratch_operands = 0 : i64, tpu.core_type = #tpu.core_type<tc>, window_params = [{transform_indices = @transform_0, window_bounds = array<i64: 1, 16, 64>}, {pipeline_mode = #tpu.pipeline_mode<synchronous>, transform_indices = @transform_1, window_bounds = array<i64: 64, 128>}, {pipeline_mode = #tpu.pipeline_mode<synchronous>, transform_indices = @transform_2, window_bounds = array<i64: 1, 128>}, {transform_indices = @transform_3, window_bounds = array<i64: 1, 1, 16>}, {transform_indices = @transform_4, window_bounds = array<i64: 1, 16, 16>}]} {
    %c0 = arith.constant 0 : index
    %c0_0 = arith.constant 0 : index
    %c0_1 = arith.constant 0 : index
    %0 = vector.load %arg1[%c0, %c0_0, %c0_1] : memref<1x16x64xf32, #tpu.memory_space<vmem>>, vector<1x16x64xf32>
    %1 = vector.shape_cast %0 : vector<1x16x64xf32> to vector<16x64xf32>
    %2 = arith.truncf %1 : vector<16x64xf32> to vector<16x64xbf16>
    %c0_2 = arith.constant 0 : index
    %c0_3 = arith.constant 0 : index
    %3 = vector.load %arg2[%c0_2, %c0_3] : memref<64x128xbf16, #tpu.memory_space<vmem>>, vector<64x128xbf16>
    %cst = arith.constant dense<0.000000e+00> : vector<16x128xf32>
    %4 = tpu.matmul %2, %3, %cst {dimension_numbers = #tpu.dot_dimension_numbers<[1], [0], [0], [1], [0, 0, 1, 1], [], []>} : vector<16x64xbf16>, vector<64x128xbf16>, vector<16x128xf32> -> vector<16x128xf32>
    %c0_4 = arith.constant 0 : index
    %c0_5 = arith.constant 0 : index
    %5 = vector.load %arg3[%c0_4, %c0_5] : memref<1x128xf32, #tpu.memory_space<vmem>>, vector<1x128xf32>
    %6 = vector.broadcast %5 : vector<1x128xf32> to vector<16x128xf32>
    %7 = arith.addf %4, %6 : vector<16x128xf32>
    %8 = vector.extract_strided_slice %7 {offsets = [0, 0], sizes = [16, 64], strides = [1, 1]} : vector<16x128xf32> to vector<16x64xf32>
    %9 = arith.truncf %8 : vector<16x64xf32> to vector<16x64xbf16>
    %10 = vector.extract_strided_slice %7 {offsets = [0, 64], sizes = [16, 64], strides = [1, 1]} : vector<16x128xf32> to vector<16x64xf32>
    %11 = arith.truncf %10 : vector<16x64xf32> to vector<16x64xbf16>
    %cst_6 = arith.constant dense<0.000000e+00> : vector<16x16xf32>
    %12 = tpu.matmul %9, %11, %cst_6 {dimension_numbers = #tpu.dot_dimension_numbers<[1], [1], [0], [0], [0, 0, 1, 0], [], []>} : vector<16x64xbf16>, vector<16x64xbf16>, vector<16x16xf32> -> vector<16x16xf32>
    %cst_7 = arith.constant 1.250000e-01 : f32
    %13 = vector.broadcast %cst_7 : f32 to vector<16x16xf32>
    %14 = arith.mulf %12, %13 : vector<16x16xf32>
    %c0_8 = arith.constant 0 : index
    %c0_9 = arith.constant 0 : index
    %c0_10 = arith.constant 0 : index
    %15 = vector.load %arg4[%c0_8, %c0_9, %c0_10] : memref<1x1x16xf32, #tpu.memory_space<vmem>>, vector<1x1x16xf32>
    %16 = vector.shape_cast %15 : vector<1x1x16xf32> to vector<1x16xf32>
    %cst_11 = arith.constant 1.000000e+00 : f32
    %17 = vector.broadcast %cst_11 : f32 to vector<1x16xf32>
    %18 = arith.subf %17, %16 : vector<1x16xf32>
    %cst_12 = arith.constant -1.000000e+09 : f32
    %19 = vector.broadcast %cst_12 : f32 to vector<1x16xf32>
    %20 = arith.mulf %18, %19 : vector<1x16xf32>
    %21 = vector.broadcast %20 : vector<1x16xf32> to vector<16x16xf32>
    %22 = arith.addf %14, %21 : vector<16x16xf32>
    %c0_13 = arith.constant 0 : index
    %c0_14 = arith.constant 0 : index
    %c0_15 = arith.constant 0 : index
    %23 = vector.load %arg5[%c0_13, %c0_14, %c0_15] : memref<1x16x16xf32, #tpu.memory_space<vmem>>, vector<1x16x16xf32>
    %24 = vector.shape_cast %23 : vector<1x16x16xf32> to vector<16x16xf32>
    %25 = vector.shape_cast %22 : vector<16x16xf32> to vector<1x16x16xf32>
    tpu.vector_store %arg5[%c0_13, %c0_14, %c0_15], %25 {strides = array<i32>} : memref<1x16x16xf32, #tpu.memory_space<vmem>>, vector<1x16x16xf32>,
    return
  }
  func.func @transform_0(%arg0: i32) -> (i32, i32, i32) {
    %c0_i32 = arith.constant 0 : i32
    %c0_i32_0 = arith.constant 0 : i32
    %c0_i32_1 = arith.constant 0 : i32
    return %arg0, %c0_i32, %c0_i32_0 : i32, i32, i32
  }
  func.func @transform_1(%arg0: i32) -> (i32, i32) {
    %c0_i32 = arith.constant 0 : i32
    %c0_i32_0 = arith.constant 0 : i32
    %c0_i32_1 = arith.constant 0 : i32
    return %c0_i32, %c0_i32_0 : i32, i32
  }
  func.func @transform_2(%arg0: i32) -> (i32, i32) {
    %c0_i32 = arith.constant 0 : i32
    %c0_i32_0 = arith.constant 0 : i32
    %c0_i32_1 = arith.constant 0 : i32
    return %c0_i32, %c0_i32_0 : i32, i32
  }
  func.func @transform_3(%arg0: i32) -> (i32, i32, i32) {
    %c0_i32 = arith.constant 0 : i32
    %c0_i32_0 = arith.constant 0 : i32
    %c0_i32_1 = arith.constant 0 : i32
    return %arg0, %c0_i32, %c0_i32_0 : i32, i32, i32
  }
  func.func @transform_4(%arg0: i32) -> (i32, i32, i32) {
    %c0_i32 = arith.constant 0 : i32
    %c0_i32_0 = arith.constant 0 : i32
    %c0_i32_1 = arith.constant 0 : i32
    return %arg0, %c0_i32, %c0_i32_0 : i32, i32, i32
  }
}

</mosaic_0001>

<bundles_post_ra>
// kernel: fortap_tuta_forward.5
= control target key start
LH: loop header
LB: loop body
LE: loop exit
PB: predicated region body
PF: predicated region fallthrough
CT: control target
= control target key end

     0   :  { %vm51_vm0 = vcmask 1044480   ;;  %vm52_vm1 = vcmask 1045504   ;;  %v224_v1 = vmov 65535   ;;  %vm44_vm2 = vcmask 89088   ;;  %s320_s2 = inlined_call_operand.vmem [shape: bf16[11,64], index: 2, kind: input, shape index: {}]   ;;  %s321_s1 = inlined_call_operand.vmem [shape: f32[32,11], index: 1, kind: input, shape index: {}]   ;;  %s322_s3 = inlined_call_operand.vmem [shape: f32[1,64], index: 3, kind: input, shape index: {}]   ;;  %s323_s0 = inlined_call_operand.vmem [shape: f32[32,64], index: 0, kind: input, shape index: {}]   ;;  %s324_s4 = inlined_call_operand.vmem [shape: f32[1,64], index: 4, kind: input, shape index: {}]   ;;  %s325_s5 = inlined_call_operand.vmem [shape: f32[1,64], index: 5, kind: input, shape index: {}]   ;;  %s326_s6 = inlined_call_operand.vmem [shape: f32[32,64], index: 6, kind: output, shape index: {}]  }
   0x1   :  { %v215_v0 = vld [vmem:[%s320_s2] sm:$0x3f]   ;;  %v53_v2 = vsel %vm51_vm0, 4294967295, %v224_v1  ;;  %v25_v4 = vld [vmem:[%s321_s1 + $0x8] sm:$0xff]  ;;  %v26_v7 = vld [vmem:[%s321_s1 + $0x10] sm:$0xff]  ;;  %vm117_vm3 = vcmask 523264  }
   0x2   :  { %v24_v3 = vld [vmem:[%s321_s1] sm:$0xff]  ;;  %v54_v5 = vsel %vm52_vm1, %v53_v2, 0  ;;  %v27_v8 = vld [vmem:[%s321_s1 + $0x18] sm:$0xff]  ;;  %v109_v13 = vld [vmem:[%s323_s0 + $0x10] sm:$0xff] }
   0x3   :  { %v28_v6 = vpack.c.bf16 %v25_v4, %v24_v3  ;;  %v56_v9 = vand.u32 %v215_v0, %v54_v5  ;;  %v29_v10 = vpack.c.bf16 %v27_v8, %v26_v7  ;;  %v199_v11 = vld [vmem:[%s322_s3] ss:$0 sm:$0xff]  ;;  %v110_v19 = vld [vmem:[%s323_s0 + $0x18] sm:$0xff]  ;;  %v108_v23 = vld [vmem:[%s323_s0 + $0x8] sm:$0xff] }
   0x4   :  { %v107_v16 = vld [vmem:[%s323_s0] sm:$0xff] }
   0x5   :  { %210 = vmatprep.mubr.msk.bf16.mxu0 %vm44_vm2, %v28_v6  ;;  %208 = vmatprep.subr.bf16.mxu0 %v56_v9  ;;  %v203_v1 = vld [vmem:[%s324_s4] ss:$0 sm:$0xff] }
   0x6   :  { %209 = vmatpush3.bf16.msra.mxu0 %v56_v9  ;;  %v204_v3 = vld [vmem:[%s325_s5] ss:$0 sm:$0xff] }
   0x9   :  { %211 = vmatmul.mubr.msk.bf16.vlgmr.msra.gmra.mrb[0].mxu0 %vm44_vm2, %v29_v10 }
  0xdc   :  { %v212_v12 = vpop.f32.mrb[0].mxu0 }
  0xdd   :  { %v101_v14 = vadd.f32 %v212_v12, %v199_v11  ;;  %v92_v15 = vpop.f32.mrb[1].mxu0 }
  0xde   :  { %v93_v17 = vadd.f32 %v199_v11, %v92_v15  ;;  %v213_v18 = vpop.f32.mrb[2].mxu0 }
  0xdf   :  { %v104_v20 = vadd.f32 %v213_v18, %v199_v11  ;;  %v95_v21 = vpop.f32.mrb[3].mxu0  ;;  %v113_v22 = vadd.f32 %v109_v13, %v101_v14 }
  0xe0   :  { %v96_v24 = vadd.f32 %v199_v11, %v95_v21  ;;  %v111_v25 = vadd.f32 %v107_v16, %v93_v17 }
  0xe1   :  { %v124_v26 = vsel %vm117_vm3, %v113_v22, 0.0  ;;  %v114_v27 = vadd.f32 %v110_v19, %v104_v20 }
  0xe2   :  { %125 = vadd.xlane.f32.xlu1 %v124_v26  ;;  %v118_v28 = vsel %vm117_vm3, %v111_v25, 0.0  ;;  %v112_v29 = vadd.f32 %v108_v23, %v96_v24 }
  0xe3   :  { %119 = vadd.xlane.f32.xlu0 %v118_v28  ;;  %v127_v30 = vsel %vm117_vm3, %v114_v27, 0.0 }
  0xe4   :  { %v121_v31 = vsel %vm117_vm3, %v112_v29, 0.0 }
  0xe6   :  { %128 = vadd.xlane.f32.xlu1 %v127_v30 }
  0xe7   :  { %122 = vadd.xlane.f32.xlu0 %v121_v31 }
 0x16f   :  { %v126_v32 = vpop.xlane.xlu1 %125 }
 0x170   :  { %v133_v33 = vmul.f32 0.015625, %v126_v32  ;;  %v120_v34 = vpop.xlane.xlu0 %119 }
 0x171   :  { %v131_v35 = vmul.f32 0.015625, %v120_v34 }
 0x172   :  { %v137_v36 = vsub.f32 %v113_v22, %v133_v33 }
 0x173   :  { %v135_v37 = vsub.f32 %v111_v25, %v131_v35  ;;  %v129_v38 = vpop.xlane.xlu1 %128 }
 0x174   :  { %v134_v39 = vmul.f32 0.015625, %v129_v38  ;;  %v123_v40 = vpop.xlane.xlu0 %122  ;;  %v141_v46 = vmul.f32 %v137_v36, %v137_v36 }
 0x175   :  { %v132_v41 = vmul.f32 0.015625, %v123_v40  ;;  %v139_v42 = vmul.f32 %v135_v37, %v135_v37 }
 0x176   :  { %v138_v43 = vsub.f32 %v114_v27, %v134_v39  ;;  %v149_v48 = vsel %vm117_vm3, %v141_v46, 0.0 }
 0x177   :  { %v136_v44 = vsub.f32 %v112_v29, %v132_v41  ;;  %v143_v45 = vsel %vm117_vm3, %v139_v42, 0.0 }
 0x178   :  { %144 = vadd.xlane.f32.xlu0 %v143_v45  ;;  %v142_v50 = vmul.f32 %v138_v43, %v138_v43 }
 0x179   :  { %v140_v47 = vmul.f32 %v136_v44, %v136_v44 }
 0x17a   :  { %v152_v51 = vsel %vm117_vm3, %v142_v50, 0.0 }
 0x17b   :  { %v146_v49 = vsel %vm117_vm3, %v140_v47, 0.0 }
 0x17c   :  { %150 = vadd.xlane.f32.xlu0 %v149_v48  ;;  %147 = vadd.xlane.f32.xlu1 %v146_v49 }
 0x180   :  { %153 = vadd.xlane.f32.xlu1 %v152_v51 }
 0x205   :  { %v145_v52 = vpop.xlane.xlu0 %144 }
 0x206   :  { %v155_v53 = vmul.f32 0.015625, %v145_v52 }
 0x208   :  { %v159_v54 = vadd.f32 1e-12, %v155_v53 }
 0x209   :  { %v148_v55 = vpop.xlane.xlu1 %147  ;;  %v151_v56 = vpop.xlane.xlu0 %150 }
 0x20a   :  { %216 = vrsqrt.f32 %v159_v54  ;;  %v156_v57 = vmul.f32 0.015625, %v148_v55  ;;  %v157_v58 = vmul.f32 0.015625, %v151_v56 }
 0x20c   :  { %v160_v59 = vadd.f32 1e-12, %v156_v57  ;;  %v161_v60 = vadd.f32 1e-12, %v157_v58 }
 0x20d   :  { %v154_v61 = vpop.xlane.xlu1 %153 }
 0x20e   :  { %218 = vrsqrt.f32 %v160_v59  ;;  %v158_v62 = vmul.f32 0.015625, %v154_v61 }
 0x20f   :  { %220 = vrsqrt.f32 %v161_v60 }
 0x210   :  { %v162_v63 = vadd.f32 1e-12, %v158_v62 }
 0x212   :  { %222 = vrsqrt.f32 %v162_v63 }
 0x214   :  { %v217_v0 = vpop.eup %216 }
 0x215   :  { %v167_v2 = vmul.f32 %v217_v0, %v135_v37 }
 0x217   :  { %v177_v4 = vmul.f32 %v203_v1, %v167_v2 }
 0x218   :  { %v219_v5 = vpop.eup %218 }
 0x219   :  { %v221_v6 = vpop.eup %220  ;;  %v187_v7 = vadd.f32 %v204_v3, %v177_v4  ;;  %v168_v8 = vmul.f32 %v219_v5, %v136_v44 }
 0x21a   :  { %v169_v9 = vmul.f32 %v221_v6, %v137_v36 }
 0x21b   :  { %191 = vst.msk [vmem:[%s326_s6] sm:$0xff] %vm117_vm3, %v187_v7  ;;  %v178_v10 = vmul.f32 %v203_v1, %v168_v8 }
 0x21c   :  { %v223_v11 = vpop.eup %222  ;;  %v179_v12 = vmul.f32 %v203_v1, %v169_v9 }
 0x21d   :  { %v188_v13 = vadd.f32 %v204_v3, %v178_v10  ;;  %v170_v14 = vmul.f32 %v223_v11, %v138_v43 }
 0x21e   :  { %v189_v15 = vadd.f32 %v204_v3, %v179_v12 }
 0x21f   :  { %192 = vst.msk [vmem:[%s326_s6 + $0x8] sm:$0xff] %vm117_vm3, %v188_v13  ;;  %v180_v16 = vmul.f32 %v203_v1, %v170_v14 }
 0x220   :  { %193 = vst.msk [vmem:[%s326_s6 + $0x10] sm:$0xff] %vm117_vm3, %v189_v15 }
 0x221   :  { %v190_v17 = vadd.f32 %v204_v3, %v180_v16 }
 0x223   :  { %194 = vst.msk [vmem:[%s326_s6 + $0x18] sm:$0xff] %vm117_vm3, %v190_v17 }

// kernel: fortap_tuta_forward.6
= control target key start
LH: loop header
LB: loop body
LE: loop exit
PB: predicated region body
PF: predicated region fallthrough
CT: control target
= control target key end

     0   :  { %s1971_s29 = smov 0   ;;  %s2218_s0 = inlined_call_operand.vmem [shape: f32[2,16,64], index: 0, kind: input, shape index: {}]   ;;  %s2219_s1 = inlined_call_operand.vmem [shape: f32[2,1,16], index: 1, kind: input, shape index: {}]   ;;  %s2220_s2 = inlined_call_operand.vmem [shape: bf16[64,192], index: 2, kind: input, shape index: {}]   ;;  %s2221_s3 = inlined_call_operand.vmem [shape: f32[1,192], index: 3, kind: input, shape index: {}]   ;;  %s2222_s4 = inlined_call_operand.vmem [shape: bf16[64,64], index: 4, kind: input, shape index: {}]   ;;  %s2223_s5 = inlined_call_operand.vmem [shape: f32[1,64], index: 5, kind: input, shape index: {}]   ;;  %s2224_s6 = inlined_call_operand.vmem [shape: f32[1,64], index: 6, kind: input, shape index: {}]   ;;  %s2225_s7 = inlined_call_operand.vmem [shape: f32[1,64], index: 7, kind: input, shape index: {}]   ;;  %s2226_s8 = inlined_call_operand.vmem [shape: bf16[64,128], index: 8, kind: input, shape index: {}]   ;;  %s2227_s9 = inlined_call_operand.vmem [shape: f32[1,128], index: 9, kind: input, shape index: {}]   ;;  %s2228_s10 = inlined_call_operand.vmem [shape: bf16[128,64], index: 10, kind: input, shape index: {}]   ;;  %s2229_s11 = inlined_call_operand.vmem [shape: f32[1,64], index: 11, kind: input, shape index: {}]   ;;  %s2230_s12 = inlined_call_operand.vmem [shape: f32[1,64], index: 12, kind: input, shape index: {}]   ;;  %s2231_s13 = inlined_call_operand.vmem [shape: f32[1,64], index: 13, kind: input, shape index: {}]   ;;  %s2232_s14 = inlined_call_operand.vmem [shape: f32[2,16,64], index: 14, kind: output, shape index: {}]  }
   0x1 LB: > { %s1590_s30 = sadd.s32 4294967295, %s1884_s29   ;;  %p1594_p0 = scmp.ge.s32.totalorder %s1884_s29, 1  ;;  %s1884_s29 = sphi %s1971_s29, %s24_s29  }
   0x2   : > { %p420_p1 = scmp.lt.s32.totalorder %s1884_s29, 3 }
   0x4   : > { %p421_p2 = pnand %p1594_p0, %p420_p1 }
   0x5   : > { %v1806_v0 = vld [vmem:[%s2220_s2 + $0x4] ss:$8 sps:$4 sm:$0xff] (!%p421_p2)   ;;  %p469_p3 = scmp.lt.s32.totalorder (!%p421_p2), %s1590_s30, 1  ;;  %v1808_v1 = vld [vmem:[%s2220_s2] ss:$8 sps:$4 sm:$0xff] (!%p421_p2)   ;;  %v1886_v2 = vmov (!%p421_p2), 0   ;;  %v497_v12 = vlaneseq (!%p421_p2) }
   0x6   : > { %424 = sbr.rel (%p421_p2) target bundleno = 2608 (0xa30), region = 76  ;;  %583 = vmatprep.mubr.bf16.mxu1 (!%p421_p2), %v1886_v2  ;;  %551 = vmatprep.subr.bf16.mxu1 (!%p421_p2), %v1806_v0  ;;  %v1809_v3 = vld [vmem:[%s2220_s2 + $0x14] ss:$8 sps:$4 sm:$0xff] (!%p421_p2)   ;;  %v1811_v4 = vld [vmem:[%s2220_s2 + $0x10] ss:$8 sps:$4 sm:$0xff] (!%p421_p2)   ;;  %vm547_vm0 = vcmask (!%p421_p2), 523264  }
   0x7   : > { %552 = vmatpush1.bf16.msra.mxu1 (!%p421_p2), %v1808_v1  ;;  %v1812_v5 = vld [vmem:[%s2220_s2 + $0x24] ss:$8 sps:$4 sm:$0xff] (!%p421_p2)   ;;  %v1814_v6 = vld [vmem:[%s2220_s2 + $0x20] ss:$8 sps:$4 sm:$0xff] (!%p421_p2)   ;;  %v1815_v7 = vld [vmem:[%s2220_s2 + $0x34] ss:$8 sps:$4 sm:$0xff] (!%p421_p2)  }
   0x8   : > { %553 = vmatprep.subr.bf16.mxu1 (!%p421_p2), %v1809_v3  ;;  %v1817_v8 = vld [vmem:[%s2220_s2 + $0x30] ss:$8 sps:$4 sm:$0xff] (!%p421_p2)   ;;  %v498_v13 = vshrl.u32 (!%p421_p2), %v497_v12, 7  ;;  %v1887_v14 = vmov (!%p421_p2), 0.0   ;;  %v495_v16 = vld [vmem:[%s2221_s3] sm:$0x3] (!%p421_p2) }
   0x9   : > { %1693 = vmatprep.subr.bf16.mxu0 (!%p421_p2), %v1887_v14  ;;  %vm1888_vm1 = vmmov (!%p421_p2), 0   ;;  %s1889_s23 = smov (!%p421_p2), 112   ;;  %s1890_s24 = smov (!%p421_p2), 64   ;;  %vm599_vm2 = vcmask (!%p421_p2), 130048   ;;  %vm1126_vm3 = vcmask (!%p421_p2), 261120   ;;  %vm1129_vm4 = vcmask (!%p421_p2), 392192  }
   0xa   : > { %v499_v15 = vsub.s32 (!%p421_p2), 0, %v498_v13  ;;  %v503_v17 = vsub.s32 (!%p421_p2), 1, %v498_v13  ;;  %1695 = vmatprep.mubr.msk.bf16.mxu0 (!%p421_p2), %vm1888_vm1, %v1887_v14  ;;  %s1891_s26 = smov (!%p421_p2), 32   ;;  %s1892_s27 = smov (!%p421_p2), 48  }
   0xb   : > { %554 = vmatpush1.bf16.msra.mxu1 (!%p421_p2), %v1811_v4  ;;  %s1893_s28 = smov (!%p421_p2), 16   ;;  %s1894_s15 = smov (!%p421_p2), 96  }
   0xc   : > { %555 = vmatprep.subr.bf16.mxu1 (!%p421_p2), %v1812_v5  ;;  %v500_v18 = vrot.slane (!%p421_p2), %v495_v16, %v499_v15  ;;  %v504_v20 = vrot.slane (!%p421_p2), %v495_v16, %v503_v17  ;;  %s1895_s16 = smov (!%p421_p2), 80  }
   0xd   : > { %s2234_s30 = smov (!%p469_p3, %s1590_s30), 1 }
   0xe   : > { %s1644_s25 = sshll.u32 %s2234_s30, 4  ;;  %s476_s19 = scalar_lea.vmem %s2219_s1, %s2234_s30 }
   0xf   : > { %s473_s18 = scalar_lea.vmem %s2218_s0, %s1644_s25  ;;  %556 = vmatpush1.bf16.msra.mxu1 %v1814_v6  ;;  %v1609_v41 = vld [vmem:[%s476_s19] ss:$0 sm:$0xff] }
  0x10   : > { %v2011_v9 = vld [vmem:[%s473_s18] sm:$0xff]  ;;  %v2013_v10 = vld [vmem:[%s473_s18 + $0x8] sm:$0xff]  ;;  %557 = vmatprep.subr.bf16.mxu1 %v1815_v7 }
  0x11   : > { %v486_v11 = vpack.c.bf16 %v2013_v10, %v2011_v9 }
  0x13   : > { %558 = vmatpush1.bf16.msra.mxu1 %v1817_v8 }
  0x14   : > { %1681 = vmatprep.subr.bf16.mxu1 %v1887_v14 }
  0x16   : > { %1607 = vmatmul.mubr.msk.bf16.vlgmr.msra.gmra.mrb[0].mxu1 %vm547_vm0, %v486_v11 }
  0x17   : > { %1683 = vmatprep.mubr.msk.bf16.mxu1 %vm1888_vm1, %v1887_v14 }
  0xe9   : > { %v585_v19 = vpop.f32.mrb[0].mxu1 }
  0xea   : > { %v587_v21 = vpop.f32.mrb[1].mxu1  ;;  %v586_v23 = vadd.f32 %v585_v19, %v500_v18 }
  0xeb   : > { %v589_v22 = vpop.f32.mrb[2].mxu1  ;;  %v588_v26 = vadd.f32 %v587_v21, %v504_v20 }
  0xec   : > { %v590_v24 = vadd.f32 %v589_v22, %v500_v18  ;;  %v591_v25 = vpop.f32.mrb[3].mxu1 }
  0xed   : > { %v592_v27 = vadd.f32 %v591_v25, %v504_v20 }
  0xee   : > { %v594_v28 = vpack.c.bf16 %v590_v24, %v586_v23 }
  0xef   : > { %v2027_v29 = vpack.c.bf16 %v592_v27, %v588_v26 }
  0xf0   : > { %724 = vrot.lane.b32.xlu1 %v594_v28, %s1889_s23  ;;  %597 = vrot.lane.b32.xlu0 %v594_v28, %s1890_s24 }
  0xf4   : > { %852 = vrot.lane.b32.xlu1 %v594_v28, %s1891_s26  ;;  %726 = vrot.lane.b32.xlu0 %v594_v28, %s1892_s27 }
  0xf8   : > { %977 = vrot.lane.b32.xlu1 %v594_v28, %s1893_s28  ;;  %850 = vrot.lane.b32.xlu0 %v594_v28, %s1894_s15 }
  0xfc   : > { %975 = vrot.lane.b32.xlu0 %v594_v28, %s1895_s16 }
 0x162   : > { %v598_v30 = vpop.permute.xlu0 %597  ;;  %v725_v32 = vpop.permute.xlu1 %724 }
 0x163   : > { %v604_v31 = vsel %vm599_vm2, %v598_v30, 0 }
 0x164   : > { %1682 = vmatpush3.bf16.xpose.msra.mxu1 %v604_v31 }
 0x165   : > { %1687 = vmatprep.subr.bf16.mxu1 %v1887_v14 }
 0x166   : > { %v727_v33 = vpop.permute.xlu0 %726  ;;  %v853_v35 = vpop.permute.xlu1 %852 }
 0x167   : > { %v732_v34 = vsel %vm599_vm2, %v727_v33, 0  ;;  %v858_v36 = vsel %vm599_vm2, %v853_v35, 0 }
 0x168   : > { %1694 = vmatpush3.bf16.xpose.msra.mxu0 %v732_v34 }
 0x169   : > { %1705 = vmatprep.subr.bf16.mxu0 %v1887_v14 }
 0x16a   : > { %v978_v37 = vpop.permute.xlu1 %977  ;;  %v851_v38 = vpop.permute.xlu0 %850 }
 0x16b   : > { %1684 = vmatmul.mubr.msk.bf16.vlgmr.msra.gmra.mrb[4].mxu1 %vm599_vm2, %v594_v28  ;;  %v983_v39 = vsel %vm599_vm2, %v978_v37, 0 }
 0x16c   : > { %1688 = vmatpush3.bf16.msra.mxu1 %v2027_v29  ;;  %1689 = vmatprep.mubr.msk.bf16.mxu1 %vm1888_vm1, %v1887_v14 }
 0x16d   : > { %1699 = vmatprep.subr.bf16.mxu1 %v1887_v14 }
 0x16e   : > { %v976_v40 = vpop.permute.xlu0 %975 }
 0x16f   : > { %1696 = vmatmul.mubr.msk.bf16.vlgmr.msra.gmra.mrb[0].mxu0 %vm599_vm2, %v725_v32 }
 0x170   : > { %1706 = vmatpush3.bf16.xpose.msra.mxu0 %v858_v36  ;;  %1707 = vmatprep.mubr.msk.bf16.mxu0 %vm1888_vm1, %v1887_v14 }
 0x171   : > { %1717 = vmatprep.subr.bf16.mxu0 %v1887_v14 }
 0x177   : > { %1708 = vmatmul.mubr.msk.bf16.vlgmr.msra.gmra.mrb[4].mxu0 %vm599_vm2, %v851_v38 }
 0x178   : > { %1718 = vmatpush3.bf16.xpose.msra.mxu0 %v983_v39  ;;  %1719 = vmatprep.mubr.msk.bf16.mxu0 %vm1888_vm1, %v1887_v14 }
 0x179   : > { %1729 = vmatprep.subr.bf16.mxu0 %v1887_v14 }
 0x17f   : > { %1720 = vmatmul.mubr.msk.bf16.vlgmr.msra.gmra.mrb[8].mxu0 %vm599_vm2, %v976_v40 }
 0x180   : > { %1737 = vmatprep.mubr.msk.bf16.mxu0 %vm1888_vm1, %v1887_v14 }
 0x23e   : > { %v640_v42 = vpop.f32.mrb[4].mxu1 }
 0x23f   : > { %v647_v43 = vmul.f32 0.25, %v640_v42  ;;  %v1685_v44 = vpop.f32.mrb[5].mxu1 }
 0x240   : > { %v643_v45 = vpop.f32.mrb[6].mxu1 }
 0x241   : > { %v648_v46 = vmul.f32 0.25, %v643_v45  ;;  %v1686_v47 = vpop.f32.mrb[7].mxu1  ;;  %v655_v48 = vadd.f32 %v1609_v41, %v647_v43 }
 0x242   : > { %v768_v49 = vpop.f32.mrb[0].mxu0 }
 0x243   : > { %v775_v50 = vmul.f32 0.25, %v768_v49  ;;  %v1697_v51 = vpop.f32.mrb[1].mxu0  ;;  %v657_v52 = vsel %vm599_vm2, %v655_v48, -inf  ;;  %v656_v53 = vadd.f32 %v1609_v41, %v648_v46 }
 0x244   : > { %658 = vmax.xlane.f32.xlu1 %v657_v52  ;;  %v771_v54 = vpop.f32.mrb[2].mxu0 }
 0x245   : > { %v776_v55 = vmul.f32 0.25, %v771_v54  ;;  %v1698_v56 = vpop.f32.mrb[3].mxu0  ;;  %v660_v57 = vsel %vm599_vm2, %v656_v53, -inf  ;;  %v777_v58 = vadd.f32 %v1609_v41, %v775_v50 }
 0x246   : > { %661 = vmax.xlane.f32.xlu0 %v660_v57 }
 0x247   : > { %v778_v59 = vadd.f32 %v1609_v41, %v776_v55  ;;  %v779_v60 = vsel %vm599_vm2, %v777_v58, -inf }
 0x249   : > { %v782_v61 = vsel %vm599_vm2, %v778_v59, -inf }
 0x24a   : > { %780 = vmax.xlane.f32.xlu0 %v779_v60  ;;  %783 = vmax.xlane.f32.xlu1 %v782_v61  ;;  %v894_v62 = vpop.f32.mrb[4].mxu0 }
 0x24b   : > { %v901_v63 = vmul.f32 0.25, %v894_v62  ;;  %v1709_v0 = vpop.f32.mrb[5].mxu0 }
 0x24c   : > { %v897_v1 = vpop.f32.mrb[6].mxu0 }
 0x24d   : > { %v902_v2 = vmul.f32 0.25, %v897_v1  ;;  %v1710_v3 = vpop.f32.mrb[7].mxu0  ;;  %v903_v4 = vadd.f32 %v1609_v41, %v901_v63 }
 0x24f   : > { %v905_v5 = vsel %vm599_vm2, %v903_v4, -inf  ;;  %v904_v6 = vadd.f32 %v1609_v41, %v902_v2 }
 0x250   : > { %906 = vmax.xlane.f32.xlu0 %v905_v5 }
 0x251   : > { %v908_v7 = vsel %vm599_vm2, %v904_v6, -inf }
 0x252   : > { %909 = vmax.xlane.f32.xlu1 %v908_v7  ;;  %v1019_v8 = vpop.f32.mrb[8].mxu0 }
 0x253   : > { %v1026_v11 = vmul.f32 0.25, %v1019_v8  ;;  %v1721_v12 = vpop.f32.mrb[9].mxu0 }
 0x254   : > { %v1022_v13 = vpop.f32.mrb[10].mxu0 }
 0x255   : > { %v1027_v15 = vmul.f32 0.25, %v1022_v13  ;;  %v1722_v16 = vpop.f32.mrb[11].mxu0  ;;  %v1028_v17 = vadd.f32 %v1609_v41, %v1026_v11 }
 0x257   : > { %v1030_v18 = vsel %vm599_vm2, %v1028_v17, -inf  ;;  %v1029_v19 = vadd.f32 %v1609_v41, %v1027_v15 }
 0x258   : > { %1031 = vmax.xlane.f32.xlu0 %v1030_v18 }
 0x259   : > { %v1033_v20 = vsel %vm599_vm2, %v1029_v19, -inf }
 0x25a   : > { %1034 = vmax.xlane.f32.xlu1 %v1033_v20 }
 0x2d1   : > { %v659_v21 = vpop.xlane.xlu1 %658 }
 0x2d2   : > { %v663_v22 = vsub.f32 %v655_v48, %v659_v21 }
 0x2d3   : > { %v662_v23 = vpop.xlane.xlu0 %661 }
 0x2d4   : > { %v665_v24 = vmul.f32 1.442695, %v663_v22  ;;  %v664_v25 = vsub.f32 %v656_v53, %v662_v23 }
 0x2d6   : > { %1834 = vpow2.f32 %v665_v24  ;;  %v667_v26 = vmul.f32 1.442695, %v664_v25 }
 0x2d7   : > { %v784_v27 = vpop.xlane.xlu1 %783  ;;  %v781_v28 = vpop.xlane.xlu0 %780 }
 0x2d8   : > { %1836 = vpow2.f32 %v667_v26  ;;  %v786_v30 = vsub.f32 %v778_v59, %v784_v27  ;;  %v785_v31 = vsub.f32 %v777_v58, %v781_v28 }
 0x2da   : > { %v789_v32 = vmul.f32 1.442695, %v786_v30  ;;  %v787_v33 = vmul.f32 1.442695, %v785_v31 }
 0x2dc   : > { %1838 = vpow2.f32 %v789_v32 }
 0x2dd   : > { %1840 = vpow2.f32 %v787_v33  ;;  %v907_v34 = vpop.xlane.xlu0 %906 }
 0x2de   : > { %v911_v35 = vsub.f32 %v903_v4, %v907_v34 }
 0x2df   : > { %v910_v36 = vpop.xlane.xlu1 %909 }
 0x2e0   : > { %v1835_v37 = vpop.eup %1834  ;;  %v913_v38 = vmul.f32 1.442695, %v911_v35  ;;  %v912_v39 = vsub.f32 %v904_v6, %v910_v36 }
 0x2e1   : > { %v669_v40 = vsel %vm599_vm2, %v1835_v37, 0.0 }
 0x2e2   : > { %v1837_v41 = vpop.eup %1836  ;;  %1842 = vpow2.f32 %v913_v38  ;;  %v915_v42 = vmul.f32 1.442695, %v912_v39  ;;  %670 = vadd.xlane.f32.xlu0 %v669_v40  ;;  %v1818_v39 = vld [vmem:[%s2222_s4] sm:$0xff]  }
 0x2e3   : > { %v672_v43 = vsel %vm599_vm2, %v1837_v41, 0.0  ;;  %1730 = vmatpush3.bf16.msra.mxu0 %v1818_v39 }
 0x2e4   : > { %1844 = vpow2.f32 %v915_v42  ;;  %673 = vadd.xlane.f32.xlu1 %v672_v43  ;;  %v1819_v42 = vld [vmem:[%s2222_s4 + $0x8] sm:$0xff]   ;;  %1731 = vmatprep.subr.bf16.mxu0 %v1887_v14 }
 0x2e5   : > { %v1032_v44 = vpop.xlane.xlu0 %1031 }
 0x2e6   : > { %v1839_v45 = vpop.eup %1838  ;;  %v1036_v46 = vsub.f32 %v1028_v17, %v1032_v44  ;;  %v1820_v44 = vld [vmem:[%s2222_s4 + $0x10] sm:$0xff]  }
 0x2e7   : > { %v1841_v47 = vpop.eup %1840  ;;  %v794_v48 = vsel %vm599_vm2, %v1839_v45, 0.0  ;;  %v1035_v57 = vpop.xlane.xlu1 %1034  ;;  %1732 = vmatpush3.bf16.msra.mxu0 %v1819_v42 }
 0x2e8   : > { %v1038_v49 = vmul.f32 1.442695, %v1036_v46  ;;  %795 = vadd.xlane.f32.xlu1 %v794_v48  ;;  %v791_v50 = vsel %vm599_vm2, %v1841_v47, 0.0  ;;  %v1037_v58 = vsub.f32 %v1029_v19, %v1035_v57  ;;  %1733 = vmatprep.subr.bf16.mxu0 %v1887_v14 }
 0x2e9   : > { %792 = vadd.xlane.f32.xlu0 %v791_v50 }
 0x2ea   : > { %1846 = vpow2.f32 %v1038_v49  ;;  %v1040_v59 = vmul.f32 1.442695, %v1037_v58  ;;  %v1821_v49 = vld [vmem:[%s2222_s4 + $0x18] sm:$0xff]  }
 0x2eb   : > { %1734 = vmatpush3.bf16.msra.mxu0 %v1820_v44 }
 0x2ec   : > { %v1843_v51 = vpop.eup %1842  ;;  %1848 = vpow2.f32 %v1040_v59  ;;  %1735 = vmatprep.subr.bf16.mxu0 %v1887_v14 }
 0x2ed   : > { %v917_v52 = vsel %vm599_vm2, %v1843_v51, 0.0 }
 0x2ee   : > { %v1845_v53 = vpop.eup %1844  ;;  %918 = vadd.xlane.f32.xlu0 %v917_v52 }
 0x2ef   : > { %v920_v54 = vsel %vm599_vm2, %v1845_v53, 0.0  ;;  %1736 = vmatpush3.bf16.msra.mxu0 %v1821_v49 }
 0x2f0   : > { %921 = vadd.xlane.f32.xlu1 %v920_v54  ;;  %1753 = vmatprep.subr.bf16.mxu0 %v1887_v14 }
 0x2f4   : > { %v1847_v55 = vpop.eup %1846 }
 0x2f5   : > { %v1042_v56 = vsel %vm599_vm2, %v1847_v55, 0.0 }
 0x2f6   : > { %1043 = vadd.xlane.f32.xlu0 %v1042_v56  ;;  %v1849_v60 = vpop.eup %1848 }
 0x2f7   : > { %v1045_v61 = vsel %vm599_vm2, %v1849_v60, 0.0 }
 0x301   : > { %928 = vrot.lane.b32.xlu1 %v2027_v29, %s1894_s15 }
 0x30c   : > { %803 = vrot.lane.b32.xlu0 %v2027_v29, %s1889_s23 }
 0x325   : > { %1046 = vadd.xlane.f32.xlu1 %v1045_v61 }
 0x336   : > { %1053 = vrot.lane.b32.xlu1 %v2027_v29, %s1895_s16 }
 0x36f   : > { %v671_v62 = vpop.xlane.xlu0 %670 }
 0x370   : > { %1850 = vrcp.f32 %v671_v62 }
 0x371   : > { %v674_v63 = vpop.xlane.xlu1 %673 }
 0x372   : > { %1852 = vrcp.f32 %v674_v63 }
 0x375   : > { %v796_v0 = vpop.xlane.xlu1 %795 }
 0x376   : > { %v793_v1 = vpop.xlane.xlu0 %792  ;;  %1854 = vrcp.f32 %v796_v0 }
 0x377   : > { %1856 = vrcp.f32 %v793_v1 }
 0x37a   : > { %v1851_v2 = vpop.eup %1850 }
 0x37b   : > { %v677_v4 = vmul.f32 %v1851_v2, %v1835_v37  ;;  %v919_v7 = vpop.xlane.xlu0 %918 }
 0x37c   : > { %v1853_v3 = vpop.eup %1852 }
 0x37d   : > { %v678_v5 = vmul.f32 %v1853_v3, %v1837_v41  ;;  %v922_v6 = vpop.xlane.xlu1 %921 }
 0x37e   : > { %1858 = vrcp.f32 %v922_v6 }
 0x37f   : > { %v679_v8 = vpack.c.bf16 %v678_v5, %v677_v4  ;;  %1860 = vrcp.f32 %v919_v7  ;;  %v1617_v7 = vld [vmem:[%s2223_s5] ss:$0 sm:$0xff] }
 0x380   : > { %v1855_v11 = vpop.eup %1854 }
 0x381   : > { %1690 = vmatmul.mubr.msk.bf16.vlgmr.msra.gmra.mrb[8].mxu1 %vm599_vm2, %v679_v8  ;;  %v1857_v29 = vpop.eup %1856  ;;  %v800_v13 = vmul.f32 %v1855_v11, %v1839_v45  ;;  %v929_v19 = vpop.permute.xlu1 %928 }
 0x382   : > { %1701 = vmatprep.mubr.msk.bf16.mxu1 %vm1888_vm1, %v1887_v14  ;;  %v799_v15 = vmul.f32 %v1857_v29, %v1841_v47 }
 0x383   : > { %v1044_v12 = vpop.xlane.xlu0 %1043 }
 0x384   : > { %v801_v17 = vpack.c.bf16 %v800_v13, %v799_v15  ;;  %1862 = vrcp.f32 %v1044_v12 }
 0x387   : > { %v804_v16 = vpop.permute.xlu0 %803 }
 0x388   : > { %1700 = vmatpush3.bf16.msra.mxu1 %v804_v16  ;;  %v1859_v18 = vpop.eup %1858 }
 0x389   : > { %1711 = vmatprep.subr.bf16.mxu1 %v1887_v14  ;;  %v1861_v20 = vpop.eup %1860  ;;  %v926_v21 = vmul.f32 %v1859_v18, %v1845_v53 }
 0x38a   : > { %v925_v22 = vmul.f32 %v1861_v20, %v1843_v51 }
 0x38b   : > { %1702 = vmatmul.mubr.msk.bf16.vlgmr.msra.gmra.mrb[12].mxu1 %vm599_vm2, %v801_v17 }
 0x38c   : > { %1712 = vmatpush3.bf16.msra.mxu1 %v929_v19  ;;  %1713 = vmatprep.mubr.msk.bf16.mxu1 %vm1888_vm1, %v1887_v14  ;;  %v927_v23 = vpack.c.bf16 %v926_v21, %v925_v22 }
 0x38d   : > { %1723 = vmatprep.subr.bf16.mxu1 %v1887_v14 }
 0x38e   : > { %v1863_v26 = vpop.eup %1862 }
 0x38f   : > { %v1050_v28 = vmul.f32 %v1863_v26, %v1847_v55 }
 0x393   : > { %1714 = vmatmul.mubr.msk.bf16.vlgmr.msra.gmra.mrb[16].mxu1 %vm599_vm2, %v927_v23 }
 0x394   : > { %1725 = vmatprep.mubr.msk.bf16.mxu1 %vm1888_vm1, %v1887_v14 }
 0x3b2   : > { %v1047_v24 = vpop.xlane.xlu1 %1046 }
 0x3b3   : > { %1864 = vrcp.f32 %v1047_v24 }
 0x3b6   : > { %v1054_v25 = vpop.permute.xlu1 %1053 }
 0x3b7   : > { %1724 = vmatpush3.bf16.msra.mxu1 %v1054_v25 }
 0x3b8   : > { %1741 = vmatprep.subr.bf16.mxu1 %v1887_v14 }
 0x3bd   : > { %v1865_v27 = vpop.eup %1864 }
 0x3be   : > { %v1051_v30 = vmul.f32 %v1865_v27, %v1849_v60 }
 0x3c0   : > { %v1052_v31 = vpack.c.bf16 %v1051_v30, %v1050_v28  ;;  %v1823_v30 = vld [vmem:[%s2226_s8 + $0x8] sm:$0xff]  }
 0x3c2   : > { %1726 = vmatmul.mubr.msk.bf16.vlgmr.msra.gmra.mrb[20].mxu1 %vm599_vm2, %v1052_v31  ;;  %v1824_v31 = vld [vmem:[%s2226_s8 + $0x10] sm:$0xff]  }
 0x3c3   : > { %1749 = vmatprep.mubr.msk.bf16.mxu1 %vm1888_vm1, %v1887_v14 }
 0x454   : > { %v717_v32 = vpop.f32.mrb[8].mxu1 }
 0x455   : > { %v1691_v33 = vpop.f32.mrb[9].mxu1 }
 0x456   : > { %v720_v34 = vpop.f32.mrb[10].mxu1 }
 0x457   : > { %v1692_v35 = vpop.f32.mrb[11].mxu1 }
 0x45e   : > { %v843_v36 = vpop.f32.mrb[12].mxu1 }
 0x45f   : > { %v1703_v37 = vpop.f32.mrb[13].mxu1 }
 0x460   : > { %v846_v38 = vpop.f32.mrb[14].mxu1 }
 0x461   : > { %v1791_v40 = vpack.i.bf16 %v846_v38, %v843_v36  ;;  %v1704_v41 = vpop.f32.mrb[15].mxu1 }
 0x463   : > { %1792 = vrot.lane.b32.xlu0 %v1791_v40, %s1893_s28  ;;  %v1623_v40 = vld [vmem:[%s2224_s6] ss:$0 sm:$0xff] }
 0x466   : > { %v968_v43 = vpop.f32.mrb[16].mxu1 }
 0x467   : > { %v1715_v45 = vpop.f32.mrb[17].mxu1 }
 0x468   : > { %v971_v46 = vpop.f32.mrb[18].mxu1  ;;  %v1624_v45 = vld [vmem:[%s2225_s7] ss:$0 sm:$0xff] }
 0x469   : > { %v1796_v47 = vpack.i.bf16 %v971_v46, %v968_v43  ;;  %v1716_v48 = vpop.f32.mrb[19].mxu1 }
 0x46b   : > { %1797 = vrot.lane.b32.xlu1 %v1796_v47, %s1891_s26 }
 0x495   : > { %v1093_v50 = vpop.f32.mrb[20].mxu1 }
 0x496   : > { %v1727_v51 = vpop.f32.mrb[21].mxu1 }
 0x497   : > { %v1096_v52 = vpop.f32.mrb[22].mxu1  ;;  %v1827_v51 = vld [vmem:[%s2228_s10 + $0x8] sm:$0xff]  }
 0x498   : > { %v1801_v53 = vpack.i.bf16 %v1096_v52, %v1093_v50  ;;  %v1728_v54 = vpop.f32.mrb[23].mxu1  ;;  %v1826_v50 = vld [vmem:[%s2228_s10] sm:$0xff]   ;;  %v1828_v52 = vld [vmem:[%s2228_s10 + $0x10] sm:$0xff]  }
 0x499   : > { %v1830_v54 = vld [vmem:[%s2228_s10 + $0x20] sm:$0xff]  }
 0x49a   : > { %1802 = vrot.lane.b32.xlu0 %v1801_v53, %s1892_s27  ;;  %v1829_v53 = vld [vmem:[%s2228_s10 + $0x18] sm:$0xff]   ;;  %s481_s27 = scalar_lea.vmem %s2232_s14, %s1644_s25 }
 0x4d5   : > { %v1793_v55 = vpop.permute.xlu0 %1792 }
 0x4d6   : > { %v1795_v57 = vunpack.i.h.bf16 %v1793_v55  ;;  %v1794_v58 = vunpack.i.l.bf16 %v1793_v55  ;;  %v1831_v55 = vld [vmem:[%s2228_s10 + $0x28] sm:$0xff]  }
 0x4d8   : > { %v1125_v62 = vsel %vm599_vm2, %v720_v34, %v1795_v57  ;;  %v1124_v63 = vsel %vm599_vm2, %v717_v32, %v1794_v58  ;;  %v1825_v32 = vld [vmem:[%s2226_s8 + $0x18] sm:$0xff]   ;;  %v1625_v58 = vld [vmem:[%s2227_s9] ss:$0 sm:$0xff] }
 0x4d9   : > { %v1833_v57 = vld [vmem:[%s2228_s10 + $0x38] sm:$0xff]  }
 0x4dd   : > { %v1798_v56 = vpop.permute.xlu1 %1797 }
 0x4de   : > { %v1800_v59 = vunpack.i.h.bf16 %v1798_v56  ;;  %v1799_v60 = vunpack.i.l.bf16 %v1798_v56  ;;  %v1832_v56 = vld [vmem:[%s2228_s10 + $0x30] sm:$0xff]  }
 0x4e0   : > { %v1128_v2 = vsel %vm1126_vm3, %v1125_v62, %v1800_v59  ;;  %v1127_v3 = vsel %vm1126_vm3, %v1124_v63, %v1799_v60 }
 0x50c   : > { %v1803_v61 = vpop.permute.xlu0 %1802 }
 0x50d   : > { %v1805_v0 = vunpack.i.h.bf16 %v1803_v61  ;;  %v1804_v1 = vunpack.i.l.bf16 %v1803_v61 }
 0x50f   : > { %v1131_v4 = vsel %vm1129_vm4, %v1128_v2, %v1805_v0  ;;  %v1130_v5 = vsel %vm1129_vm4, %v1127_v3, %v1804_v1 }
 0x510   : > { %v1132_v6 = vpack.c.bf16 %v1131_v4, %v1130_v5 }
 0x512   : > { %1738 = vmatmul.mubr.msk.bf16.vlgmr.msra.gmra.mrb[12].mxu0 %vm547_vm0, %v1132_v6 }
 0x513   : > { %1769 = vmatprep.mubr.msk.bf16.mxu0 %vm1888_vm1, %v1887_v14  ;;  %1754 = vmatpush3.bf16.msra.mxu0 %v1826_v50 }
 0x514   : > { %1755 = vmatprep.subr.bf16.mxu0 %v1887_v14 }
 0x517   : > { %1756 = vmatpush3.bf16.msra.mxu0 %v1827_v51  ;;  %v1641_v51 = vld [vmem:[%s2231_s13] ss:$0 sm:$0xff] }
 0x518   : > { %1757 = vmatprep.subr.bf16.mxu0 %v1887_v14 }
 0x51b   : > { %1758 = vmatpush3.bf16.msra.mxu0 %v1828_v52 }
 0x51c   : > { %1759 = vmatprep.subr.bf16.mxu0 %v1887_v14 }
 0x51f   : > { %1760 = vmatpush3.bf16.msra.mxu0 %v1829_v53 }
 0x520   : > { %1761 = vmatprep.subr.bf16.mxu0 %v1887_v14 }
 0x523   : > { %1762 = vmatpush3.bf16.msra.mxu0 %v1830_v54 }
 0x524   : > { %1763 = vmatprep.subr.bf16.mxu0 %v1887_v14 }
 0x527   : > { %1764 = vmatpush3.bf16.msra.mxu0 %v1831_v55 }
 0x528   : > { %1765 = vmatprep.subr.bf16.mxu0 %v1887_v14 }
 0x52b   : > { %1766 = vmatpush3.bf16.msra.mxu0 %v1832_v56 }
 0x52c   : > { %1767 = vmatprep.subr.bf16.mxu0 %v1887_v14 }
 0x52f   : > { %1768 = vmatpush3.bf16.msra.mxu0 %v1833_v57 }
 0x5e5   : > { %v1209_v8 = vpop.f32.mrb[12].mxu0 }
 0x5e6   : > { %v1210_v11 = vadd.f32 %v1617_v7, %v1209_v8  ;;  %v1739_v29 = vpop.f32.mrb[13].mxu0 }
 0x5e7   : > { %v1212_v12 = vpop.f32.mrb[14].mxu0 }
 0x5e8   : > { %v1213_v13 = vadd.f32 %v1617_v7, %v1212_v12  ;;  %v1740_v15 = vpop.f32.mrb[15].mxu0  ;;  %v1216_v16 = vadd.f32 %v1210_v11, %v2011_v9 }
 0x5ea   : > { %v1220_v17 = vsel %vm547_vm0, %v1216_v16, 0.0  ;;  %v1217_v18 = vadd.f32 %v1213_v13, %v2013_v10  ;;  %v1822_v10 = vld [vmem:[%s2226_s8] sm:$0xff]  }
 0x5eb   : > { %1221 = vadd.xlane.f32.xlu1 %v1220_v17  ;;  %1742 = vmatpush3.bf16.msra.mxu1 %v1822_v10 }
 0x5ec   : > { %v1223_v19 = vsel %vm547_vm0, %v1217_v18, 0.0  ;;  %1743 = vmatprep.subr.bf16.mxu1 %v1887_v14 }
 0x5ed   : > { %1224 = vadd.xlane.f32.xlu0 %v1223_v19 }
 0x5ef   : > { %1744 = vmatpush3.bf16.msra.mxu1 %v1823_v30 }
 0x5f0   : > { %1745 = vmatprep.subr.bf16.mxu1 %v1887_v14 }
 0x5f3   : > { %1746 = vmatpush3.bf16.msra.mxu1 %v1824_v31 }
 0x5f4   : > { %1747 = vmatprep.subr.bf16.mxu1 %v1887_v14 }
 0x5f7   : > { %1748 = vmatpush3.bf16.msra.mxu1 %v1825_v32 }
 0x678   : > { %v1222_v20 = vpop.xlane.xlu1 %1221 }
 0x679   : > { %v1227_v21 = vmul.f32 0.015625, %v1222_v20 }
 0x67a   : > { %v1225_v22 = vpop.xlane.xlu0 %1224 }
 0x67b   : > { %v1229_v23 = vsub.f32 %v1216_v16, %v1227_v21  ;;  %v1228_v24 = vmul.f32 0.015625, %v1225_v22  ;;  %v1631_v21 = vld [vmem:[%s2229_s11] ss:$0 sm:$0xff] }
 0x67d   : > { %v1230_v25 = vsub.f32 %v1217_v18, %v1228_v24  ;;  %v1231_v26 = vmul.f32 %v1229_v23, %v1229_v23 }
 0x67f   : > { %v1233_v27 = vsel %vm547_vm0, %v1231_v26, 0.0  ;;  %v1232_v28 = vmul.f32 %v1230_v25, %v1230_v25 }
 0x680   : > { %1234 = vadd.xlane.f32.xlu0 %v1233_v27 }
 0x681   : > { %v1236_v9 = vsel %vm547_vm0, %v1232_v28, 0.0 }
 0x682   : > { %1237 = vadd.xlane.f32.xlu1 %v1236_v9 }
 0x70d   : > { %v1235_v33 = vpop.xlane.xlu0 %1234 }
 0x70e   : > { %v1239_v34 = vmul.f32 0.015625, %v1235_v33 }
 0x70f   : > { %v1238_v35 = vpop.xlane.xlu1 %1237 }
 0x710   : > { %v1241_v36 = vadd.f32 1e-12, %v1239_v34  ;;  %v1240_v37 = vmul.f32 0.015625, %v1238_v35 }
 0x712   : > { %1866 = vrsqrt.f32 %v1241_v36  ;;  %v1242_v38 = vadd.f32 1e-12, %v1240_v37 }
 0x714   : > { %1868 = vrsqrt.f32 %v1242_v38 }
 0x71c   : > { %v1867_v39 = vpop.eup %1866 }
 0x71d   : > { %v1245_v41 = vmul.f32 %v1867_v39, %v1229_v23 }
 0x71e   : > { %v1869_v42 = vpop.eup %1868 }
 0x71f   : > { %v1253_v43 = vmul.f32 %v1623_v40, %v1245_v41  ;;  %v1246_v44 = vmul.f32 %v1869_v42, %v1230_v25 }
 0x721   : > { %v1254_v46 = vmul.f32 %v1623_v40, %v1246_v44  ;;  %v2152_v47 = vadd.f32 %v1624_v45, %v1253_v43 }
 0x723   : > { %v2154_v48 = vadd.f32 %v1624_v45, %v1254_v46 }
 0x725   : > { %v1263_v49 = vpack.c.bf16 %v2154_v48, %v2152_v47 }
 0x727   : > { %1750 = vmatmul.mubr.msk.bf16.vlgmr.msra.gmra.mrb[24].mxu1 %vm547_vm0, %v1263_v49 }
 0x7fa   : > { %v1340_v59 = vpop.f32.mrb[24].mxu1 }
 0x7fb   : > { %v1341_v60 = vadd.f32 %v1625_v58, %v1340_v59  ;;  %v1751_v61 = vpop.f32.mrb[25].mxu1 }
 0x7fc   : > { %v1343_v62 = vpop.f32.mrb[26].mxu1 }
 0x7fd   : > { %v1347_v63 = vmul.f32 %v1341_v60, %v1341_v60  ;;  %v1344_v0 = vadd.f32 %v1625_v58, %v1343_v62  ;;  %v1752_v1 = vpop.f32.mrb[27].mxu1 }
 0x7ff   : > { %v1349_v2 = vmul.f32 %v1347_v63, %v1341_v60  ;;  %v1348_v3 = vmul.f32 %v1344_v0, %v1344_v0 }
 0x801   : > { %v1351_v4 = vmul.f32 0.044715, %v1349_v2  ;;  %v1350_v14 = vmul.f32 %v1348_v3, %v1344_v0 }
 0x803   : > { %v1353_v5 = vadd.f32 %v1351_v4, %v1341_v60  ;;  %v1352_v6 = vmul.f32 0.044715, %v1350_v14 }
 0x805   : > { %v1355_v7 = vmul.f32 0.7978846, %v1353_v5  ;;  %v1354_v8 = vadd.f32 %v1352_v6, %v1344_v0 }
 0x807   : > { %1870 = vtanh.f32 %v1355_v7  ;;  %v1356_v11 = vmul.f32 0.7978846, %v1354_v8 }
 0x809   : > { %1872 = vtanh.f32 %v1356_v11 }
 0x811   : > { %v1871_v29 = vpop.eup %1870 }
 0x812   : > { %v1359_v12 = vadd.f32 1.0, %v1871_v29 }
 0x813   : > { %v1873_v13 = vpop.eup %1872 }
 0x814   : > { %v1361_v15 = vmul.f32 0.5, %v1359_v12  ;;  %v1360_v16 = vadd.f32 1.0, %v1873_v13 }
 0x816   : > { %v1362_v17 = vmul.f32 0.5, %v1360_v16  ;;  %v1363_v18 = vmul.f32 %v1361_v15, %v1341_v60 }
 0x818   : > { %v1364_v19 = vmul.f32 %v1362_v17, %v1344_v0 }
 0x81a   : > { %v1365_v20 = vpack.c.bf16 %v1364_v19, %v1363_v18 }
 0x81c   : > { %1770 = vmatmul.mubr.bf16.vlgmr.msra.gmra.mrb[16].mxu0 %v1365_v20 }
 0x8ef   : > { %v1471_v22 = vpop.f32.mrb[16].mxu0 }
 0x8f0   : > { %v1472_v23 = vadd.f32 %v1631_v21, %v1471_v22  ;;  %v1771_v24 = vpop.f32.mrb[17].mxu0 }
 0x8f1   : > { %v1474_v25 = vpop.f32.mrb[18].mxu0 }
 0x8f2   : > { %v1475_v26 = vadd.f32 %v1631_v21, %v1474_v25  ;;  %v1772_v27 = vpop.f32.mrb[19].mxu0  ;;  %v1478_v28 = vadd.f32 %v1472_v23, %v2152_v47 }
 0x8f4   : > { %v1482_v9 = vsel %vm547_vm0, %v1478_v28, 0.0  ;;  %v1479_v10 = vadd.f32 %v1475_v26, %v2154_v48  ;;  %v1640_v48 = vld [vmem:[%s2230_s12] ss:$0 sm:$0xff] }
 0x8f5   : > { %1483 = vadd.xlane.f32.xlu0 %v1482_v9 }
 0x8f6   : > { %v1485_v30 = vsel %vm547_vm0, %v1479_v10, 0.0 }
 0x8f7   : > { %1486 = vadd.xlane.f32.xlu1 %v1485_v30 }
 0x982   : > { %v1484_v31 = vpop.xlane.xlu0 %1483 }
 0x983   : > { %v1488_v32 = vmul.f32 0.015625, %v1484_v31 }
 0x984   : > { %v1487_v33 = vpop.xlane.xlu1 %1486 }
 0x985   : > { %v1490_v34 = vsub.f32 %v1478_v28, %v1488_v32  ;;  %v1489_v35 = vmul.f32 0.015625, %v1487_v33 }
 0x987   : > { %v1491_v36 = vsub.f32 %v1479_v10, %v1489_v35  ;;  %v1492_v37 = vmul.f32 %v1490_v34, %v1490_v34 }
 0x989   : > { %v1494_v38 = vsel %vm547_vm0, %v1492_v37, 0.0  ;;  %v1493_v39 = vmul.f32 %v1491_v36, %v1491_v36 }
 0x98a   : > { %1495 = vadd.xlane.f32.xlu0 %v1494_v38 }
 0x98b   : > { %v1497_v40 = vsel %vm547_vm0, %v1493_v39, 0.0 }
 0x98c   : > { %1498 = vadd.xlane.f32.xlu1 %v1497_v40 }
 0xa17   : > { %v1496_v41 = vpop.xlane.xlu0 %1495 }
 0xa18   : > { %v1500_v42 = vmul.f32 0.015625, %v1496_v41 }
 0xa19   : > { %v1499_v43 = vpop.xlane.xlu1 %1498 }
 0xa1a   : > { %v1502_v44 = vadd.f32 1e-12, %v1500_v42  ;;  %v1501_v45 = vmul.f32 0.015625, %v1499_v43 }
 0xa1c   : > { %1874 = vrsqrt.f32 %v1502_v44  ;;  %v1503_v46 = vadd.f32 1e-12, %v1501_v45 }
 0xa1e   : > { %1876 = vrsqrt.f32 %v1503_v46 }
 0xa26   : > { %v1875_v47 = vpop.eup %1874 }
 0xa27   : > { %v1506_v49 = vmul.f32 %v1875_v47, %v1490_v34 }
 0xa28   : > { %v1877_v50 = vpop.eup %1876 }
 0xa29   : > { %v1514_v52 = vmul.f32 %v1640_v48, %v1506_v49  ;;  %v1507_v53 = vmul.f32 %v1877_v50, %v1491_v36 }
 0xa2b   : > { %v1522_v54 = vadd.f32 %v1641_v51, %v1514_v52  ;;  %v1515_v55 = vmul.f32 %v1640_v48, %v1507_v53 }
 0xa2d   : > { %1524 = vst.msk [vmem:[%s481_s27] sm:$0xff] %vm547_vm0, %v1522_v54  ;;  %v1523_v56 = vadd.f32 %v1641_v51, %v1515_v55 }
 0xa2f   : > { %1525 = vst.msk [vmem:[%s481_s27 + $0x8] sm:$0xff] %vm547_vm0, %v1523_v56 }
 0xa30 PF: > { %s24_s29 = sadd.s32 1, %s1884_s29  }
 0xa31   : > { %p21_p4 = scmp.ge.s32.totalorder %s24_s29, 4  }
 0xa33   :  { %23 = sbr.rel (!%p21_p4) target bundleno = 1 (0x1), region = 109 }

// kernel: fortap_tuta_forward.8
= control target key start
LH: loop header
LB: loop body
LE: loop exit
PB: predicated region body
PF: predicated region fallthrough
CT: control target
= control target key end

     0   :  { %vm99_vm0 = vcmask 523264   ;;  %s1348_s1 = inlined_call_operand.vmem [shape: bf16[64,64], index: 1, kind: input, shape index: {}]   ;;  %s1349_s0 = inlined_call_operand.vmem [shape: f32[32,64], index: 0, kind: input, shape index: {}]   ;;  %s1350_s7 = inlined_call_operand.vmem [shape: bf16[64,64], index: 7, kind: input, shape index: {}]   ;;  %s1351_s2 = inlined_call_operand.vmem [shape: f32[1,64], index: 2, kind: input, shape index: {}]   ;;  %s1352_s8 = inlined_call_operand.vmem [shape: f32[1,64], index: 8, kind: input, shape index: {}]   ;;  %s1353_s5 = inlined_call_operand.vmem [shape: bf16[64,256], index: 5, kind: input, shape index: {}]   ;;  %s1354_s13 = inlined_call_operand.vmem [shape: bf16[64,128], index: 13, kind: input, shape index: {}]   ;;  %s1355_s11 = inlined_call_operand.vmem [shape: bf16[64,128], index: 11, kind: input, shape index: {}]   ;;  %s1356_s3 = inlined_call_operand.vmem [shape: f32[1,64], index: 3, kind: input, shape index: {}]   ;;  %s1357_s4 = inlined_call_operand.vmem [shape: f32[1,64], index: 4, kind: input, shape index: {}]   ;;  %s1358_s9 = inlined_call_operand.vmem [shape: f32[1,64], index: 9, kind: input, shape index: {}]   ;;  %s1359_s10 = inlined_call_operand.vmem [shape: f32[1,64], index: 10, kind: input, shape index: {}]   ;;  %s1360_s14 = inlined_call_operand.vmem [shape: f32[1,128], index: 14, kind: input, shape index: {}]   ;;  %s1361_s17 = inlined_call_operand.vmem [shape: f32[32,128], index: 17, kind: output, shape index: {2}]   ;;  %s1362_s6 = inlined_call_operand.vmem [shape: f32[1,256], index: 6, kind: input, shape index: {}]   ;;  %s1363_s15 = inlined_call_operand.vmem [shape: f32[32,256], index: 15, kind: output, shape index: {0}]   ;;  %s1364_s12 = inlined_call_operand.vmem [shape: f32[1,128], index: 12, kind: input, shape index: {}]   ;;  %s1365_s16 = inlined_call_operand.vmem [shape: f32[32,128], index: 16, kind: output, shape index: {1}]  }
   0x1   :  { %1368 = sst [smem:[#allocation2_spill]] %s1348_s1  ;;  %v916_v9 = vld [vmem:[%s1350_s7] sm:$0xff]   ;;  %v917_v11 = vld [vmem:[%s1350_s7 + $0x8] sm:$0xff]   ;;  %v918_v12 = vld [vmem:[%s1350_s7 + $0x10] sm:$0xff]  }
   0x2   :  { %1369 = sst [smem:[#allocation3_spill]] %s1349_s0  ;;  %s1370_s26 = sld [smem:[#allocation2_spill]]  ;;  %v919_v13 = vld [vmem:[%s1350_s7 + $0x18] sm:$0xff]   ;;  %v797_v14 = vld [vmem:[%s1351_s2] ss:$0 sm:$0xff] }
   0x3   :  { %s1371_s19 = sld [smem:[#allocation3_spill]]  ;;  %v816_v42 = vld [vmem:[%s1352_s8] ss:$0 sm:$0xff] }
   0x8   :  { %v912_v0 = vld [vmem:[%s1370_s26] sm:$0xff]   ;;  %v913_v1 = vld [vmem:[%s1370_s26 + $0x8] sm:$0xff]   ;;  %v914_v2 = vld [vmem:[%s1370_s26 + $0x10] sm:$0xff]  }
   0x9   :  { %863 = vmatprep.subr.bf16.mxu0 %v912_v0  ;;  %v54_v3 = vld [vmem:[%s1371_s19] sm:$0xff]  ;;  %v55_v4 = vld [vmem:[%s1371_s19 + $0x8] sm:$0xff]  ;;  %v915_v6 = vld [vmem:[%s1370_s26 + $0x18] sm:$0xff]  }
   0xa   :  { %864 = vmatpush3.bf16.msra.mxu0 %v912_v0  ;;  %v58_v5 = vpack.c.bf16 %v55_v4, %v54_v3  ;;  %v56_v7 = vld [vmem:[%s1371_s19 + $0x10] sm:$0xff]  ;;  %v57_v8 = vld [vmem:[%s1371_s19 + $0x18] sm:$0xff] }
   0xb   :  { %865 = vmatprep.subr.bf16.mxu0 %v913_v1  ;;  %v1091_v10 = vpack.c.bf16 %v57_v8, %v56_v7 }
   0xc   :  { %871 = vmatprep.mubr.msk.bf16.mxu0 %vm99_vm0, %v58_v5 }
   0xe   :  { %866 = vmatpush3.bf16.msra.mxu0 %v913_v1 }
   0xf   :  { %867 = vmatprep.subr.bf16.mxu0 %v914_v2 }
  0x12   :  { %868 = vmatpush3.bf16.msra.mxu0 %v914_v2 }
  0x13   :  { %869 = vmatprep.subr.bf16.mxu0 %v915_v6 }
  0x16   :  { %870 = vmatpush3.bf16.msra.mxu0 %v915_v6 }
  0x17   :  { %875 = vmatprep.subr.bf16.mxu0 %v916_v9 }
  0x19   :  { %872 = vmatmul.mubr.msk.bf16.vlgmr.msra.gmra.mrb[0].mxu0 %vm99_vm0, %v1091_v10 }
  0x1a   :  { %876 = vmatpush3.bf16.msra.mxu0 %v916_v9  ;;  %883 = vmatprep.mubr.msk.bf16.mxu0 %vm99_vm0, %v58_v5 }
  0x1b   :  { %877 = vmatprep.subr.bf16.mxu0 %v917_v11 }
  0x1e   :  { %878 = vmatpush3.bf16.msra.mxu0 %v917_v11 }
  0x1f   :  { %879 = vmatprep.subr.bf16.mxu0 %v918_v12 }
  0x22   :  { %880 = vmatpush3.bf16.msra.mxu0 %v918_v12 }
  0x23   :  { %881 = vmatprep.subr.bf16.mxu0 %v919_v13 }
  0x26   :  { %882 = vmatpush3.bf16.msra.mxu0 %v919_v13 }
  0x29   :  { %884 = vmatmul.mubr.msk.bf16.vlgmr.msra.gmra.mrb[4].mxu0 %vm99_vm0, %v1091_v10 }
  0x2a   :  { %907 = vmatprep.mubr.msk.bf16.mxu0 %vm99_vm0, %v58_v5 }
  0xec   :  { %v873_v15 = vpop.f32.mrb[0].mxu0 }
  0xed   :  { %v1111_v16 = vadd.f32 %v873_v15, %v797_v14  ;;  %v140_v17 = vpop.f32.mrb[1].mxu0 }
  0xee   :  { %v1113_v18 = vadd.f32 %v797_v14, %v140_v17  ;;  %v874_v19 = vpop.f32.mrb[2].mxu0 }
  0xef   :  { %v157_v20 = vmul.f32 %v1111_v16, %v1111_v16  ;;  %v1117_v21 = vadd.f32 %v874_v19, %v797_v14  ;;  %v143_v22 = vpop.f32.mrb[3].mxu0 }
  0xf0   :  { %v155_v23 = vmul.f32 %v1113_v18, %v1113_v18  ;;  %v1121_v24 = vadd.f32 %v797_v14, %v143_v22 }
  0xf1   :  { %v161_v25 = vmul.f32 %v157_v20, %v1111_v16  ;;  %v158_v26 = vmul.f32 %v1117_v21, %v1117_v21 }
  0xf2   :  { %v159_v27 = vmul.f32 %v155_v23, %v1113_v18  ;;  %v156_v28 = vmul.f32 %v1121_v24, %v1121_v24 }
  0xf3   :  { %v165_v29 = vmul.f32 0.044715, %v161_v25  ;;  %v162_v30 = vmul.f32 %v158_v26, %v1117_v21 }
  0xf4   :  { %v163_v31 = vmul.f32 0.044715, %v159_v27  ;;  %v160_v32 = vmul.f32 %v156_v28, %v1121_v24 }
  0xf5   :  { %v166_v33 = vmul.f32 0.044715, %v162_v30  ;;  %v169_v34 = vadd.f32 %v165_v29, %v1111_v16 }
  0xf6   :  { %v164_v35 = vmul.f32 0.044715, %v160_v32  ;;  %v167_v36 = vadd.f32 %v163_v31, %v1113_v18 }
  0xf7   :  { %v170_v37 = vadd.f32 %v166_v33, %v1117_v21  ;;  %v173_v38 = vmul.f32 0.7978846, %v169_v34 }
  0xf8   :  { %v168_v39 = vadd.f32 %v164_v35, %v1121_v24  ;;  %v171_v40 = vmul.f32 0.7978846, %v167_v36 }
  0xf9   :  { %940 = vtanh.f32 %v173_v38  ;;  %v174_v41 = vmul.f32 0.7978846, %v170_v37 }
  0xfa   :  { %942 = vtanh.f32 %v171_v40  ;;  %v172_v43 = vmul.f32 0.7978846, %v168_v39 }
  0xfb   :  { %944 = vtanh.f32 %v174_v41 }
  0xfc   :  { %v885_v44 = vpop.f32.mrb[4].mxu0  ;;  %946 = vtanh.f32 %v172_v43 }
  0xfd   :  { %v1138_v45 = vadd.f32 %v885_v44, %v816_v42  ;;  %v468_v46 = vpop.f32.mrb[5].mxu0 }
  0xfe   :  { %v1140_v47 = vadd.f32 %v816_v42, %v468_v46  ;;  %v886_v48 = vpop.f32.mrb[6].mxu0 }
  0xff   :  { %v485_v49 = vmul.f32 %v1138_v45, %v1138_v45  ;;  %v1144_v50 = vadd.f32 %v886_v48, %v816_v42  ;;  %v471_v51 = vpop.f32.mrb[7].mxu0 }
 0x100   :  { %v483_v52 = vmul.f32 %v1140_v47, %v1140_v47  ;;  %v472_v53 = vadd.f32 %v816_v42, %v471_v51 }
 0x101   :  { %v489_v54 = vmul.f32 %v485_v49, %v1138_v45  ;;  %v486_v55 = vmul.f32 %v1144_v50, %v1144_v50 }
 0x102   :  { %v487_v56 = vmul.f32 %v483_v52, %v1140_v47  ;;  %v484_v57 = vmul.f32 %v472_v53, %v472_v53 }
 0x103   :  { %v941_v58 = vpop.eup %940  ;;  %v493_v59 = vmul.f32 0.044715, %v489_v54  ;;  %v490_v60 = vmul.f32 %v486_v55, %v1144_v50 }
 0x104   :  { %v943_v61 = vpop.eup %942  ;;  %v491_v62 = vmul.f32 0.044715, %v487_v56  ;;  %v488_v63 = vmul.f32 %v484_v57, %v472_v53  ;;  %v181_v0 = vadd.f32 1.0, %v941_v58 }
 0x105   :  { %v945_v1 = vpop.eup %944  ;;  %v497_v2 = vadd.f32 %v493_v59, %v1138_v45  ;;  %v494_v3 = vmul.f32 0.044715, %v490_v60  ;;  %v179_v4 = vadd.f32 1.0, %v943_v61 }
 0x106   :  { %v947_v5 = vpop.eup %946  ;;  %v495_v6 = vadd.f32 %v491_v62, %v1140_v47  ;;  %v492_v7 = vmul.f32 0.044715, %v488_v63  ;;  %v185_v8 = vmul.f32 0.5, %v181_v0  ;;  %v182_v9 = vadd.f32 1.0, %v945_v1 }
 0x107   :  { %v498_v11 = vadd.f32 %v494_v3, %v1144_v50  ;;  %v183_v12 = vmul.f32 0.5, %v179_v4  ;;  %v180_v13 = vadd.f32 1.0, %v947_v5  ;;  %v501_v14 = vmul.f32 0.7978846, %v497_v2 }
 0x108   :  { %v496_v15 = vadd.f32 %v492_v7, %v472_v53  ;;  %v189_v17 = vmul.f32 %v185_v8, %v1111_v16  ;;  %v186_v19 = vmul.f32 0.5, %v182_v9  ;;  %v499_v20 = vmul.f32 0.7978846, %v495_v6 }
 0x109   :  { %v187_v22 = vmul.f32 %v183_v12, %v1113_v18  ;;  %v184_v23 = vmul.f32 0.5, %v180_v13  ;;  %948 = vtanh.f32 %v501_v14  ;;  %v502_v25 = vmul.f32 0.7978846, %v498_v11 }
 0x10a   :  { %v199_v26 = vsel %vm99_vm0, %v189_v17, 0.0  ;;  %v190_v27 = vmul.f32 %v186_v19, %v1117_v21  ;;  %950 = vtanh.f32 %v499_v20  ;;  %v500_v28 = vmul.f32 0.7978846, %v496_v15 }
 0x10b   :  { %200 = vadd.xlane.f32.xlu1 %v199_v26  ;;  %v193_v29 = vsel %vm99_vm0, %v187_v22, 0.0  ;;  %v188_v30 = vmul.f32 %v184_v23, %v1121_v24  ;;  %952 = vtanh.f32 %v502_v25 }
 0x10c   :  { %194 = vadd.xlane.f32.xlu0 %v193_v29  ;;  %954 = vtanh.f32 %v500_v28  ;;  %v202_v16 = vsel %vm99_vm0, %v190_v27, 0.0 }
 0x10d   :  { %v196_v18 = vsel %vm99_vm0, %v188_v30, 0.0 }
 0x10f   :  { %203 = vadd.xlane.f32.xlu1 %v202_v16  ;;  %v922_v16 = vld [vmem:[%s1353_s5] ss:$8 sps:$4 sm:$0xff]  }
 0x110   :  { %197 = vadd.xlane.f32.xlu0 %v196_v18  ;;  %v923_v18 = vld [vmem:[%s1353_s5 + $0x14] ss:$8 sps:$4 sm:$0xff]  }
 0x113   :  { %v949_v31 = vpop.eup %948 }
 0x114   :  { %v951_v32 = vpop.eup %950  ;;  %v509_v33 = vadd.f32 1.0, %v949_v31  ;;  %v925_v31 = vld [vmem:[%s1353_s5 + $0x10] ss:$8 sps:$4 sm:$0xff]  }
 0x115   :  { %v953_v21 = vpop.eup %952  ;;  %v507_v34 = vadd.f32 1.0, %v951_v32  ;;  %v926_v32 = vld [vmem:[%s1353_s5 + $0x24] ss:$8 sps:$4 sm:$0xff]  }
 0x116   :  { %v955_v35 = vpop.eup %954  ;;  %v510_v36 = vadd.f32 1.0, %v953_v21  ;;  %v513_v39 = vmul.f32 0.5, %v509_v33  ;;  %v928_v33 = vld [vmem:[%s1353_s5 + $0x20] ss:$8 sps:$4 sm:$0xff]   ;;  %v929_v21 = vld [vmem:[%s1353_s5 + $0x34] ss:$8 sps:$4 sm:$0xff]  }
 0x117   :  { %v511_v37 = vmul.f32 0.5, %v507_v34  ;;  %v508_v38 = vadd.f32 1.0, %v955_v35  ;;  %v931_v34 = vld [vmem:[%s1353_s5 + $0x30] ss:$8 sps:$4 sm:$0xff]   ;;  %v932_v35 = vld [vmem:[%s1354_s13] sm:$0xff]  }
 0x118   :  { %v514_v41 = vmul.f32 0.5, %v510_v36  ;;  %v517_v44 = vmul.f32 %v513_v39, %v1138_v45  ;;  %v972_v36 = vmov 0   ;;  %899 = vmatprep.subr.bf16.mxu0 %v932_v35  ;;  %v936_v39 = vld [vmem:[%s1354_s13 + $0x10] sm:$0xff]  }
 0x119   :  { %v515_v24 = vmul.f32 %v511_v37, %v1140_v47  ;;  %v512_v40 = vmul.f32 0.5, %v508_v38  ;;  %366 = vmatprep.mubr.bf16.mxu1 %v972_v36  ;;  %900 = vmatpush3.bf16.msra.mxu0 %v932_v35  ;;  %v1242_v37 = vld [vmem:[%s1355_s11] sm:$0xff]   ;;  %v934_v38 = vld [vmem:[%s1354_s13 + $0x8] sm:$0xff]  }
 0x11a   :  { %v518_v48 = vmul.f32 %v514_v41, %v1144_v50  ;;  %v527_v49 = vsel %vm99_vm0, %v517_v44, 0.0  ;;  %901 = vmatprep.subr.bf16.mxu0 %v934_v38  ;;  %v824_v35 = vld [vmem:[%s1359_s10] ss:$0 sm:$0xff] }
 0x11b   :  { %v521_v42 = vsel %vm99_vm0, %v515_v24, 0.0  ;;  %v516_v43 = vmul.f32 %v512_v40, %v472_v53 }
 0x11c   :  { %522 = vadd.xlane.f32.xlu0 %v521_v42  ;;  %v530_v51 = vsel %vm99_vm0, %v518_v48, 0.0 }
 0x11d   :  { %v524_v46 = vsel %vm99_vm0, %v516_v43, 0.0  ;;  %902 = vmatpush3.bf16.msra.mxu0 %v934_v38 }
 0x11e   :  { %525 = vadd.xlane.f32.xlu1 %v524_v46  ;;  %903 = vmatprep.subr.bf16.mxu0 %v936_v39 }
 0x120   :  { %528 = vadd.xlane.f32.xlu0 %v527_v49 }
 0x121   :  { %904 = vmatpush3.bf16.msra.mxu0 %v936_v39 }
 0x122   :  { %531 = vadd.xlane.f32.xlu1 %v530_v51 }
 0x198   :  { %v201_v47 = vpop.xlane.xlu1 %200 }
 0x199   :  { %v208_v52 = vmul.f32 0.015625, %v201_v47  ;;  %v195_v54 = vpop.xlane.xlu0 %194 }
 0x19a   :  { %v206_v55 = vmul.f32 0.015625, %v195_v54 }
 0x19b   :  { %v1171_v56 = vsub.f32 %v189_v17, %v208_v52 }
 0x19c   :  { %v1173_v53 = vsub.f32 %v187_v22, %v206_v55  ;;  %v204_v45 = vpop.xlane.xlu1 %203 }
 0x19d   :  { %v209_v57 = vmul.f32 0.015625, %v204_v45  ;;  %v198_v58 = vpop.xlane.xlu0 %197  ;;  %v216_v63 = vmul.f32 %v1171_v56, %v1171_v56 }
 0x19e   :  { %v207_v59 = vmul.f32 0.015625, %v198_v58  ;;  %v214_v50 = vmul.f32 %v1173_v53, %v1173_v53  ;;  %v804_v58 = vld [vmem:[%s1356_s3] ss:$0 sm:$0xff] }
 0x19f   :  { %v1177_v60 = vsub.f32 %v190_v27, %v209_v57  ;;  %v224_v1 = vsel %vm99_vm0, %v216_v63, 0.0 }
 0x1a0   :  { %v1179_v61 = vsub.f32 %v188_v30, %v207_v59  ;;  %v218_v62 = vsel %vm99_vm0, %v214_v50, 0.0  ;;  %v920_v30 = vld [vmem:[%s1353_s5 + $0x4] ss:$8 sps:$4 sm:$0xff]  }
 0x1a1   :  { %219 = vadd.xlane.f32.xlu0 %v218_v62  ;;  %v217_v3 = vmul.f32 %v1177_v60, %v1177_v60  ;;  %334 = vmatprep.subr.bf16.mxu1 %v920_v30 }
 0x1a2   :  { %v215_v0 = vmul.f32 %v1179_v61, %v1179_v61  ;;  %335 = vmatpush1.bf16.msra.mxu1 %v922_v16 }
 0x1a3   :  { %v227_v4 = vsel %vm99_vm0, %v217_v3, 0.0  ;;  %336 = vmatprep.subr.bf16.mxu1 %v923_v18 }
 0x1a4   :  { %v221_v2 = vsel %vm99_vm0, %v215_v0, 0.0 }
 0x1a5   :  { %225 = vadd.xlane.f32.xlu0 %v224_v1  ;;  %222 = vadd.xlane.f32.xlu1 %v221_v2 }
 0x1a6   :  { %337 = vmatpush1.bf16.msra.mxu1 %v925_v31 }
 0x1a7   :  { %338 = vmatprep.subr.bf16.mxu1 %v926_v32 }
 0x1a9   :  { %228 = vadd.xlane.f32.xlu1 %v227_v4  ;;  %v523_v5 = vpop.xlane.xlu0 %522 }
 0x1aa   :  { %v533_v6 = vmul.f32 0.015625, %v523_v5  ;;  %339 = vmatpush1.bf16.msra.mxu1 %v928_v33  ;;  %v939_v33 = vld [vmem:[%s1355_s11 + $0x18] sm:$0xff]  }
 0x1ab   :  { %v526_v7 = vpop.xlane.xlu1 %525  ;;  %340 = vmatprep.subr.bf16.mxu1 %v929_v21 }
 0x1ac   :  { %v1191_v8 = vsub.f32 %v515_v24, %v533_v6  ;;  %v534_v9 = vmul.f32 0.015625, %v526_v7  ;;  %v938_v24 = vld [vmem:[%s1354_s13 + $0x18] sm:$0xff]  }
 0x1ad   :  { %v529_v11 = vpop.xlane.xlu0 %528  ;;  %905 = vmatprep.subr.bf16.mxu0 %v938_v24 }
 0x1ae   :  { %v1193_v12 = vsub.f32 %v516_v43, %v534_v9  ;;  %v535_v13 = vmul.f32 0.015625, %v529_v11  ;;  %v541_v14 = vmul.f32 %v1191_v8, %v1191_v8  ;;  %341 = vmatpush1.bf16.msra.mxu1 %v931_v34  ;;  %906 = vmatpush3.bf16.msra.mxu0 %v938_v24 }
 0x1af   :  { %v532_v15 = vpop.xlane.xlu1 %531  ;;  %887 = vmatprep.subr.bf16.mxu1 %v1242_v37 }
 0x1b0   :  { %v1197_v17 = vsub.f32 %v517_v44, %v535_v13  ;;  %v536_v19 = vmul.f32 0.015625, %v532_v15  ;;  %v545_v20 = vsel %vm99_vm0, %v541_v14, 0.0  ;;  %v542_v22 = vmul.f32 %v1193_v12, %v1193_v12 }
 0x1b1   :  { %546 = vadd.xlane.f32.xlu0 %v545_v20  ;;  %908 = vmatmul.mubr.msk.bf16.vlgmr.msra.gmra.mrb[8].mxu0 %vm99_vm0, %v1091_v10 }
 0x1b2   :  { %v1202_v23 = vsub.f32 %v518_v48, %v536_v19  ;;  %v548_v25 = vsel %vm99_vm0, %v542_v22, 0.0  ;;  %v543_v26 = vmul.f32 %v1197_v17, %v1197_v17 }
 0x1b3   :  { %549 = vadd.xlane.f32.xlu1 %v548_v25  ;;  %v935_v25 = vld [vmem:[%s1355_s11 + $0x8] sm:$0xff]  }
 0x1b4   :  { %v551_v27 = vsel %vm99_vm0, %v543_v26, 0.0  ;;  %v544_v28 = vmul.f32 %v1202_v23, %v1202_v23 }
 0x1b5   :  { %552 = vadd.xlane.f32.xlu0 %v551_v27 }
 0x1b6   :  { %v554_v29 = vsel %vm99_vm0, %v544_v28, 0.0 }
 0x1b7   :  { %555 = vadd.xlane.f32.xlu1 %v554_v29  ;;  %v823_v29 = vld [vmem:[%s1358_s9] ss:$0 sm:$0xff] }
 0x22e   :  { %v220_v40 = vpop.xlane.xlu0 %219 }
 0x22f   :  { %v230_v41 = vmul.f32 0.015625, %v220_v40 }
 0x231   :  { %v234_v42 = vadd.f32 1e-12, %v230_v41 }
 0x232   :  { %v223_v43 = vpop.xlane.xlu1 %222  ;;  %v226_v44 = vpop.xlane.xlu0 %225 }
 0x233   :  { %956 = vrsqrt.f32 %v234_v42  ;;  %v231_v46 = vmul.f32 0.015625, %v223_v43  ;;  %v232_v48 = vmul.f32 0.015625, %v226_v44 }
 0x235   :  { %v235_v49 = vadd.f32 1e-12, %v231_v46  ;;  %v236_v51 = vadd.f32 1e-12, %v232_v48 }
 0x236   :  { %v229_v47 = vpop.xlane.xlu1 %228 }
 0x237   :  { %958 = vrsqrt.f32 %v235_v49  ;;  %v233_v52 = vmul.f32 0.015625, %v229_v47 }
 0x238   :  { %960 = vrsqrt.f32 %v236_v51 }
 0x239   :  { %v237_v54 = vadd.f32 1e-12, %v233_v52 }
 0x23b   :  { %962 = vrsqrt.f32 %v237_v54 }
 0x23d   :  { %v957_v55 = vpop.eup %956 }
 0x23e   :  { %v242_v45 = vmul.f32 %v957_v55, %v1173_v53  ;;  %v547_v10 = vpop.xlane.xlu0 %546  ;;  %v805_v53 = vld [vmem:[%s1357_s4] ss:$0 sm:$0xff]  ;;  %v278_v55 = vlaneseq }
 0x23f   :  { %v557_v57 = vmul.f32 0.015625, %v547_v10 }
 0x240   :  { %v550_v59 = vpop.xlane.xlu1 %549  ;;  %v252_v2 = vmul.f32 %v804_v58, %v242_v45  ;;  %v279_v45 = vshrl.u32 %v278_v55, 7 }
 0x241   :  { %v959_v50 = vpop.eup %958  ;;  %v561_v62 = vadd.f32 1e-12, %v557_v57  ;;  %v558_v63 = vmul.f32 0.015625, %v550_v59  ;;  %v276_v57 = vld [vmem:[%s1362_s6] sm:$0x3] }
 0x242   :  { %v243_v0 = vmul.f32 %v959_v50, %v1179_v61  ;;  %v553_v1 = vpop.xlane.xlu0 %552  ;;  %v961_v3 = vpop.eup %960  ;;  %v262_v15 = vadd.f32 %v805_v53, %v252_v2  ;;  %v280_v10 = vsub.s32 0, %v279_v45 }
 0x243   :  { %964 = vrsqrt.f32 %v561_v62  ;;  %v562_v4 = vadd.f32 1e-12, %v558_v63  ;;  %v559_v5 = vmul.f32 0.015625, %v553_v1  ;;  %v244_v14 = vmul.f32 %v961_v3, %v1171_v56 }
 0x244   :  { %v556_v6 = vpop.xlane.xlu1 %555  ;;  %v253_v7 = vmul.f32 %v804_v58, %v243_v0  ;;  %v281_v59 = vrot.slane %v276_v57, %v280_v10 }
 0x245   :  { %v963_v9 = vpop.eup %962  ;;  %966 = vrsqrt.f32 %v562_v4  ;;  %v563_v11 = vadd.f32 1e-12, %v559_v5  ;;  %v560_v13 = vmul.f32 0.015625, %v556_v6  ;;  %v254_v27 = vmul.f32 %v804_v58, %v244_v14 }
 0x246   :  { %v245_v61 = vmul.f32 %v963_v9, %v1177_v60  ;;  %v263_v19 = vadd.f32 %v805_v53, %v253_v7  ;;  %v937_v60 = vld [vmem:[%s1355_s11 + $0x10] sm:$0xff]  }
 0x247   :  { %968 = vrsqrt.f32 %v563_v11  ;;  %v564_v20 = vadd.f32 1e-12, %v560_v13  ;;  %v264_v16 = vadd.f32 %v805_v53, %v254_v27 }
 0x248   :  { %v266_v22 = vpack.c.bf16 %v263_v19, %v262_v15  ;;  %v255_v26 = vmul.f32 %v804_v58, %v245_v61  ;;  %v284_v58 = vsub.s32 1, %v279_v45  ;;  %v825_v15 = vld [vmem:[%s1364_s12] ss:$0 sm:$0xff] }
 0x249   :  { %970 = vrsqrt.f32 %v564_v20 }
 0x24a   :  { %814 = vmatmul.mubr.msk.bf16.vlgmr.msra.gmra.mrb[0].mxu1 %vm99_vm0, %v266_v22  ;;  %v265_v56 = vadd.f32 %v805_v53, %v255_v26  ;;  %v285_v50 = vrot.slane %v276_v57, %v284_v58 }
 0x24b   :  { %888 = vmatpush3.bf16.msra.mxu1 %v1242_v37  ;;  %376 = vmatprep.mubr.bf16.mxu1 %v972_v36 }
 0x24c   :  { %889 = vmatprep.subr.bf16.mxu1 %v935_v25  ;;  %v267_v32 = vpack.c.bf16 %v265_v56, %v264_v16 }
 0x24d   :  { %v965_v28 = vpop.eup %964 }
 0x24e   :  { %v569_v30 = vmul.f32 %v965_v28, %v1191_v8 }
 0x24f   :  { %v967_v18 = vpop.eup %966  ;;  %890 = vmatpush3.bf16.msra.mxu1 %v935_v25 }
 0x250   :  { %v570_v31 = vmul.f32 %v967_v18, %v1193_v12  ;;  %891 = vmatprep.subr.bf16.mxu1 %v937_v60  ;;  %v579_v21 = vmul.f32 %v823_v29, %v569_v30 }
 0x251   :  { %v969_v34 = vpop.eup %968 }
 0x252   :  { %v571_v36 = vmul.f32 %v969_v34, %v1197_v17  ;;  %815 = vmatmul.mubr.msk.bf16.gmra.mrb[4].mxu1 %vm99_vm0, %v267_v32  ;;  %v580_v8 = vmul.f32 %v823_v29, %v570_v31  ;;  %v589_v39 = vadd.f32 %v824_v35, %v579_v21  ;;  %v832_v17 = vld [vmem:[%s1360_s14] ss:$0 sm:$0xff] }
 0x253   :  { %v971_v37 = vpop.eup %970  ;;  %892 = vmatpush3.bf16.msra.mxu1 %v937_v60 }
 0x254   :  { %v581_v12 = vmul.f32 %v823_v29, %v571_v36  ;;  %v572_v38 = vmul.f32 %v971_v37, %v1202_v23  ;;  %893 = vmatprep.subr.bf16.mxu1 %v939_v33  ;;  %v590_v24 = vadd.f32 %v824_v35, %v580_v8 }
 0x256   :  { %v582_v40 = vmul.f32 %v823_v29, %v572_v38  ;;  %v593_v41 = vpack.c.bf16 %v590_v24, %v589_v39  ;;  %v591_v42 = vadd.f32 %v824_v35, %v581_v12 }
 0x257   :  { %894 = vmatpush3.bf16.msra.mxu1 %v939_v33 }
 0x258   :  { %v592_v43 = vadd.f32 %v824_v35, %v582_v40  ;;  %895 = vmatprep.mubr.msk.bf16.mxu1 %vm99_vm0, %v593_v41 }
 0x25a   :  { %v594_v44 = vpack.c.bf16 %v592_v43, %v591_v42 }
 0x25c   :  { %896 = vmatmul.mubr.msk.bf16.vlgmr.msra.gmra.mrb[8].mxu1 %vm99_vm0, %v594_v44 }
 0x284   :  { %v909_v46 = vpop.f32.mrb[8].mxu0 }
 0x285   :  { %v775_v48 = vadd.f32 %v909_v46, %v832_v17  ;;  %v766_v23 = vpop.f32.mrb[9].mxu0 }
 0x286   :  { %v767_v49 = vadd.f32 %v832_v17, %v766_v23  ;;  %v910_v51 = vpop.f32.mrb[10].mxu0 }
 0x287   :  { %783 = vst [vmem:[%s1361_s17 + $0x10] sm:$0xff] %v775_v48  ;;  %v778_v47 = vadd.f32 %v910_v51, %v832_v17  ;;  %v769_v52 = vpop.f32.mrb[11].mxu0 }
 0x288   :  { %781 = vst [vmem:[%s1361_s17] sm:$0xff] %v767_v49  ;;  %v770_v54 = vadd.f32 %v832_v17, %v769_v52 }
 0x289   :  { %784 = vst [vmem:[%s1361_s17 + $0x18] sm:$0xff] %v778_v47 }
 0x28a   :  { %782 = vst [vmem:[%s1361_s17 + $0x8] sm:$0xff] %v770_v54 }
 0x31d   :  { %v368_v62 = vpop.f32.mrb[0].mxu1 }
 0x31e   :  { %v369_v63 = vadd.f32 %v368_v62, %v281_v59  ;;  %v370_v0 = vpop.f32.mrb[1].mxu1 }
 0x31f   :  { %v371_v1 = vadd.f32 %v370_v0, %v285_v50  ;;  %v372_v2 = vpop.f32.mrb[2].mxu1 }
 0x320   :  { %387 = vst [vmem:[%s1363_s15] sm:$0xff] %v369_v63  ;;  %v373_v3 = vadd.f32 %v372_v2, %v281_v59  ;;  %v374_v4 = vpop.f32.mrb[3].mxu1 }
 0x321   :  { %388 = vst [vmem:[%s1363_s15 + $0x8] sm:$0xff] %v371_v1  ;;  %v375_v5 = vadd.f32 %v374_v4, %v285_v50 }
 0x322   :  { %389 = vst [vmem:[%s1363_s15 + $0x10] sm:$0xff] %v373_v3 }
 0x323   :  { %390 = vst [vmem:[%s1363_s15 + $0x18] sm:$0xff] %v375_v5 }
 0x325   :  { %v378_v53 = vpop.f32.mrb[4].mxu1 }
 0x326   :  { %v379_v6 = vadd.f32 %v378_v53, %v281_v59  ;;  %v380_v7 = vpop.f32.mrb[5].mxu1 }
 0x327   :  { %v381_v9 = vadd.f32 %v380_v7, %v285_v50  ;;  %v382_v11 = vpop.f32.mrb[6].mxu1 }
 0x328   :  { %391 = vst [vmem:[%s1363_s15 + $0x20] sm:$0xff] %v379_v6  ;;  %v383_v13 = vadd.f32 %v382_v11, %v281_v59  ;;  %v384_v14 = vpop.f32.mrb[7].mxu1 }
 0x329   :  { %392 = vst [vmem:[%s1363_s15 + $0x28] sm:$0xff] %v381_v9  ;;  %v385_v61 = vadd.f32 %v384_v14, %v285_v50 }
 0x32a   :  { %393 = vst [vmem:[%s1363_s15 + $0x30] sm:$0xff] %v383_v13 }
 0x32b   :  { %394 = vst [vmem:[%s1363_s15 + $0x38] sm:$0xff] %v385_v61 }
 0x32f   :  { %v897_v19 = vpop.f32.mrb[8].mxu1 }
 0x330   :  { %v683_v20 = vadd.f32 %v897_v19, %v825_v15  ;;  %v674_v22 = vpop.f32.mrb[9].mxu1 }
 0x331   :  { %v675_v25 = vadd.f32 %v825_v15, %v674_v22  ;;  %v898_v26 = vpop.f32.mrb[10].mxu1 }
 0x332   :  { %691 = vst [vmem:[%s1365_s16 + $0x10] sm:$0xff] %v683_v20  ;;  %v686_v27 = vadd.f32 %v898_v26, %v825_v15  ;;  %v677_v56 = vpop.f32.mrb[11].mxu1 }
 0x333   :  { %689 = vst [vmem:[%s1365_s16] sm:$0xff] %v675_v25  ;;  %v678_v60 = vadd.f32 %v825_v15, %v677_v56 }
 0x334   :  { %692 = vst [vmem:[%s1365_s16 + $0x18] sm:$0xff] %v686_v27 }
 0x335   :  { %690 = vst [vmem:[%s1365_s16 + $0x8] sm:$0xff] %v678_v60 }

// kernel: fortap_tuta_forward.9
= control target key start
LH: loop header
LB: loop body
LE: loop exit
PB: predicated region body
PF: predicated region fallthrough
CT: control target
= control target key end

     0   :  { %s527_s15 = smov 0   ;;  %s570_s0 = inlined_call_operand.vmem [shape: f32[2,16,64], index: 0, kind: input, shape index: {}]   ;;  %s571_s1 = inlined_call_operand.vmem [shape: bf16[64,128], index: 1, kind: input, shape index: {}]   ;;  %s572_s2 = inlined_call_operand.vmem [shape: f32[1,128], index: 2, kind: input, shape index: {}]   ;;  %s573_s3 = inlined_call_operand.vmem [shape: f32[2,1,16], index: 3, kind: input, shape index: {}]   ;;  %s574_s4 = inlined_call_operand.vmem [shape: f32[2,16,16], index: 4, kind: output, shape index: {}]  }
   0x1 LB: > { %s431_s16 = sadd.s32 4294967295, %s497_s15   ;;  %p435_p0 = scmp.ge.s32.totalorder %s497_s15, 1  ;;  %s497_s15 = sphi %s527_s15, %s14_s15  }
   0x2   : > { %p170_p1 = scmp.lt.s32.totalorder %s497_s15, 3 }
   0x4   : > { %p171_p2 = pnand %p435_p0, %p170_p1 }
   0x5   : > { %v487_v0 = vld [vmem:[%s571_s1] sm:$0xff] (!%p171_p2)   ;;  %v499_v1 = vmov (!%p171_p2), 0.0   ;;  %v488_v2 = vld [vmem:[%s571_s1 + $0x8] sm:$0xff] (!%p171_p2)   ;;  %vm500_vm0 = vmmov (!%p171_p2), 0   ;;  %p199_p3 = scmp.lt.s32.totalorder (!%p171_p2), %s431_s16, 1  ;;  %v489_v3 = vld [vmem:[%s571_s1 + $0x10] sm:$0xff] (!%p171_p2)   ;;  %v357_v18 = vlaneseq (!%p171_p2) }
   0x6   : > { %174 = sbr.rel (%p171_p2) target bundleno = 582 (0x246), region = 36  ;;  %458 = vmatprep.subr.bf16.mxu0 (!%p171_p2), %v499_v1  ;;  %470 = vmatprep.subr.bf16.mxu1 (!%p171_p2), %v499_v1  ;;  %v490_v4 = vld [vmem:[%s571_s1 + $0x18] sm:$0xff] (!%p171_p2)   ;;  %vm255_vm1 = vcmask (!%p171_p2), 523264   ;;  %v440_v8 = vld [vmem:[%s572_s2] ss:$0 sm:$0xff] (!%p171_p2)  ;;  %s501_s5 = smov (!%p171_p2), 64  }
   0x7   : > { %459 = vmatpush3.bf16.msra.mxu0 (!%p171_p2), %v487_v0  ;;  %466 = vmatprep.mubr.msk.bf16.mxu0 (!%p171_p2), %vm500_vm0, %v499_v1  ;;  %v358_v21 = vshrl.u32 (!%p171_p2), %v357_v18, 7  ;;  %vm364_vm2 = vcmask (!%p171_p2), 130048  }
   0x8   : > { %460 = vmatprep.subr.bf16.mxu0 (!%p171_p2), %v499_v1  ;;  %472 = vmatprep.mubr.msk.bf16.mxu1 (!%p171_p2), %vm500_vm0, %v499_v1 }
   0x9   : > { %v359_v23 = vsub.s32 (!%p171_p2), 0, %v358_v21 }
   0xb   : > { %461 = vmatpush3.bf16.msra.mxu0 (!%p171_p2), %v488_v2 }
   0xc   : > { %462 = vmatprep.subr.bf16.mxu0 (!%p171_p2), %v499_v1 }
   0xd   : > { %s576_s16 = smov (!%p199_p3, %s431_s16), 1 }
   0xe   : > { %s449_s23 = sshll.u32 %s576_s16, 4  ;;  %s206_s8 = scalar_lea.vmem %s573_s3, %s576_s16 }
   0xf   : > { %s203_s26 = scalar_lea.vmem %s570_s0, %s449_s23  ;;  %463 = vmatpush3.bf16.msra.mxu0 %v489_v3  ;;  %v353_v19 = vld [vmem:[%s206_s8] sm:$0x1]  ;;  %s211_s11 = scalar_lea.vmem %s574_s4, %s449_s23 }
  0x10   : > { %v213_v5 = vld [vmem:[%s203_s26] sm:$0xff]  ;;  %v214_v6 = vld [vmem:[%s203_s26 + $0x8] sm:$0xff]  ;;  %464 = vmatprep.subr.bf16.mxu0 %v499_v1  ;;  %v354_v20 = vsub.f32 1.0, %v353_v19 }
  0x11   : > { %v215_v7 = vpack.c.bf16 %v214_v6, %v213_v5 }
  0x12   : > { %v355_v22 = vmul.f32 -1e+09, %v354_v20 }
  0x13   : > { %465 = vmatpush3.bf16.msra.mxu0 %v490_v4 }
  0x14   : > { %v360_v24 = vrot.slane %v355_v22, %v359_v23 }
  0x16   : > { %467 = vmatmul.mubr.msk.bf16.vlgmr.msra.gmra.mrb[0].mxu0 %vm255_vm1, %v215_v7 }
  0xe9   : > { %v293_v9 = vpop.f32.mrb[0].mxu0 }
  0xea   : > { %v468_v10 = vpop.f32.mrb[1].mxu0  ;;  %v294_v12 = vadd.f32 %v440_v8, %v293_v9 }
  0xeb   : > { %v296_v11 = vpop.f32.mrb[2].mxu0 }
  0xec   : > { %v297_v13 = vadd.f32 %v440_v8, %v296_v11  ;;  %v469_v14 = vpop.f32.mrb[3].mxu0 }
  0xee   : > { %v300_v15 = vpack.c.bf16 %v297_v13, %v294_v12 }
  0xf0   : > { %302 = vrot.lane.b32.xlu0 %v300_v15, %s501_s5 }
 0x162   : > { %v303_v16 = vpop.permute.xlu0 %302 }
 0x163   : > { %v308_v17 = vsel %vm255_vm1, %v303_v16, 0 }
 0x164   : > { %471 = vmatpush3.bf16.xpose.msra.mxu1 %v308_v17 }
 0x16b   : > { %473 = vmatmul.mubr.msk.bf16.vlgmr.msra.gmra.mrb[0].mxu1 %vm255_vm1, %v300_v15 }
 0x23e   : > { %v344_v25 = vpop.f32.mrb[0].mxu1 }
 0x23f   : > { %v351_v26 = vmul.f32 0.125, %v344_v25  ;;  %v474_v27 = vpop.f32.mrb[1].mxu1 }
 0x240   : > { %v347_v28 = vpop.f32.mrb[2].mxu1 }
 0x241   : > { %v362_v29 = vadd.f32 %v360_v24, %v351_v26  ;;  %v352_v30 = vmul.f32 0.125, %v347_v28  ;;  %v475_v31 = vpop.f32.mrb[3].mxu1 }
 0x243   : > { %365 = vst.msk [vmem:[%s211_s11] sm:$0xff] %vm364_vm2, %v362_v29  ;;  %v363_v32 = vadd.f32 %v360_v24, %v352_v30 }
 0x245   : > { %366 = vst.msk [vmem:[%s211_s11 + $0x8] sm:$0xff] %vm364_vm2, %v363_v32 }
 0x246 PF: > { %s14_s15 = sadd.s32 1, %s497_s15  }
 0x247   : > { %p11_p4 = scmp.ge.s32.totalorder %s14_s15, 4  }
 0x249   :  { %13 = sbr.rel (!%p11_p4) target bundleno = 1 (0x1), region = 69 }

</bundles_post_ra>
